<compile_context>
chip_gen: v5e
topology: v5e:2x2
jax: 0.10.0
libtpu: 0.0.40
codegen_flags: <defaults>
</compile_context>

<pallas_src>
import jax
import jax.numpy as jnp
from jax.experimental import pallas as pl
from jax.experimental.pallas import tpu as pltpu

# ---- config (small, deterministic) ----
BATCH = 2
SEQ = 8
D_HIDN = 32
N_HEAD = 4
D_HEAD = 8
HDH = N_HEAD * D_HEAD          # 32
SCALE = 1.0 / (D_HEAD ** 0.5)
NEG_INF = -1000000000.0
KEEP_CAP = 1e30                # "no masking" cap value; scores never exceed this
MM_DTYPE = jnp.bfloat16        # MXU-native matmul dtype on v5e/v6e/v7x
# TODO(synk): nn.Dropout is identity in eval mode; not implemented in-kernel.


def mha_kernel(q_ref, k_ref, v_ref, cap_ref, w_qkv_ref, b_qkv_ref, wo_ref, bo_ref,
               out_ref, prob_ref):
    B, S, H, Dh, D = BATCH, SEQ, N_HEAD, D_HEAD, D_HIDN

    def project(x_ref, idx):
        # (B, S, D) -> (B*H, S, Dh) with one leading<->sublane transpose.
        x = x_ref[...].reshape(B * S, D).astype(MM_DTYPE)
        y = jnp.dot(x, w_qkv_ref[idx],
                    preferred_element_type=jnp.float32) + b_qkv_ref[idx]   # (B*S, HDH) f32
        y = y.reshape(B, S, H, Dh).transpose(0, 2, 1, 3)                   # (B, H, S, Dh)
        return y.reshape(B * H, S, Dh)

    q_h = project(q_ref, 0)      # softmax scale pre-folded into W_Q / b_Q outside
    k_h = project(k_ref, 1)
    v_h = project(v_ref, 2)

    # ---- scaled dot-product attention, (batch*head) as one leading batch dim ----
    # TODO(synk): at realistic S go flash-style: (q_tile, Dh)@(Dh, k_tile) /
    # (q_tile, k_tile)@(k_tile, Dh) with 256-multiple tiles on v6e/v7x (128 on
    # v5e), Dh padded onto the lane axis, tiles re-derived against v7x's 64 MiB
    # VMEM (explicit vmem_limit_bytes), and heads/q-tiles split over a
    # "parallel" grid axis so v7x megacore shards the work.
    scores = jnp.einsum('nqd,nkd->nqk',
                        q_h.astype(MM_DTYPE), k_h.astype(MM_DTYPE),
                        preferred_element_type=jnp.float32)        # f32 (B*H, S, S)

    # masked_fill via a single vmin: cap is NEG_INF on masked keys, +BIG elsewhere.
    scores = jnp.minimum(scores.reshape(B, H, S, S),
                         cap_ref[...][:, None, :, :])              # f32 (B, H, S, S)

    m = jnp.max(scores, axis=-1, keepdims=True)
    e = jnp.exp(scores - m)
    denom = jnp.sum(e, axis=-1, keepdims=True)
    p = e / denom                        # exact: attn_prob is exported, rows sum to 1
    prob_ref[...] = p.astype(prob_ref.dtype)                       # (B, H, S, S)

    # ---- context + output projection ----
    ctx = jnp.einsum('nqk,nkd->nqd',
                     p.reshape(B * H, S, S).astype(MM_DTYPE), v_h.astype(MM_DTYPE),
                     preferred_element_type=jnp.float32)           # f32 (B*H, S, Dh)
    ctx = ctx.reshape(B, H, S, Dh).transpose(0, 2, 1, 3).reshape(B * S, HDH)
    out = jnp.dot(ctx.astype(MM_DTYPE), wo_ref[...],
                  preferred_element_type=jnp.float32) + bo_ref[...]        # (B*S, D)
    out_ref[...] = out.reshape(B, S, D).astype(out_ref.dtype)


def prepare_params(params):
    """One-time (per model, not per call) param prep: stack Q/K/V projections,
    fold the softmax scale into W_Q/b_Q, pre-cast matmul weights to bf16."""
    wq, bq, wk, bk, wv, bv, wo, bo = params
    w_qkv = jnp.stack([wq * SCALE, wk, wv]).astype(MM_DTYPE)   # (3, D, HDH) bf16
    b_qkv = jnp.stack([bq * SCALE, bk, bv])                    # (3, 1, HDH) f32
    return w_qkv, b_qkv, wo.astype(MM_DTYPE), bo


@jax.jit
def multi_head_attention(Q, K, V, attn_mask, fused_params):
    B, S, D = Q.shape
    w_qkv, b_qkv, wo, bo = fused_params

    # f32 cap array: NEG_INF where masked, +BIG where kept -> kernel does one vmin.
    mask_cap = jnp.where(attn_mask != 0, NEG_INF, KEEP_CAP).astype(jnp.float32)

    vmem = pl.BlockSpec(memory_space=pltpu.MemorySpace.VMEM)
    out, prob = pl.pallas_call(
        mha_kernel,
        out_shape=(
            jax.ShapeDtypeStruct((B, S, D), jnp.float32),          # output
            jax.ShapeDtypeStruct((B, N_HEAD, S, S), jnp.float32),  # attn_prob
        ),
        in_specs=[vmem] * 8,
        out_specs=(vmem, vmem),
    )(Q, K, V, mask_cap, w_qkv, b_qkv, wo, bo)
    return out, prob


def reference(Q, K, V, attn_mask, params):
    """Pure-JAX f32 reference mirroring the PyTorch forward (dropout = identity)."""
    wq, bq, wk, bk, wv, bv, wo, bo = params
    B, S, D = Q.shape
    def proj(x, w, b):
        return (x @ w + b).reshape(B, S, N_HEAD, D_HEAD).transpose(0, 2, 1, 3)
    q_s, k_s, v_s = proj(Q, wq, bq), proj(K, wk, bk), proj(V, wv, bv)
    scores = jnp.einsum('bhqd,bhkd->bhqk', q_s, k_s) * SCALE
    scores = jnp.where(attn_mask[:, None, :, :] != 0, NEG_INF, scores)
    prob = jax.nn.softmax(scores, axis=-1)
    ctx = jnp.einsum('bhqk,bhkd->bhqd', prob, v_s)
    ctx = ctx.transpose(0, 2, 1, 3).reshape(B, S, HDH)
    out = ctx @ wo + bo
    return out, prob


def init_params(key):
    ks = jax.random.split(key, 8)
    def lin(kw, kb, fan_in, fan_out):
        bound = 1.0 / (fan_in ** 0.5)
        w = jax.random.uniform(kw, (fan_in, fan_out), jnp.float32, -bound, bound)
        b = jax.random.uniform(kb, (1, fan_out), jnp.float32, -bound, bound)
        return w, b
    wq, bq = lin(ks[0], ks[1], D_HIDN, HDH)
    wk, bk = lin(ks[2], ks[3], D_HIDN, HDH)
    wv, bv = lin(ks[4], ks[5], D_HIDN, HDH)
    wo, bo = lin(ks[6], ks[7], HDH, D_HIDN)
    return (wq, bq, wk, bk, wv, bv, wo, bo)


if __name__ == "__main__":
    key = jax.random.PRNGKey(0)
    kp, kq, kk, kv = jax.random.split(key, 4)

    params = init_params(kp)
    fused_params = prepare_params(params)   # static across calls; built once

    Q = jax.random.normal(kq, (BATCH, SEQ, D_HIDN), jnp.float32)
    K = jax.random.normal(kk, (BATCH, SEQ, D_HIDN), jnp.float32)
    V = jax.random.normal(kv, (BATCH, SEQ, D_HIDN), jnp.float32)
    # padding-style mask: last 2 key positions masked for batch 1, none for batch 0
    key_pad = jnp.zeros((BATCH, SEQ), jnp.int32).at[1, -2:].set(1)
    attn_mask = jnp.broadcast_to(key_pad[:, None, :], (BATCH, SEQ, SEQ)).astype(jnp.int32)

    out, prob = multi_head_attention(Q, K, V, attn_mask, fused_params)
    out = jax.block_until_ready(out)
    prob = jax.block_until_ready(prob)

    out_ref, prob_ref = reference(Q, K, V, attn_mask, params)
    # Tolerances relaxed vs. pure f32: bf16 matmul operands (f32 accumulation).
    assert jnp.allclose(out, out_ref, atol=3e-2, rtol=3e-2), \
        f"output mismatch, max abs diff {jnp.max(jnp.abs(out - out_ref))}"
    assert jnp.allclose(prob, prob_ref, atol=3e-2, rtol=3e-2), \
        f"attn_prob mismatch, max abs diff {jnp.max(jnp.abs(prob - prob_ref))}"
    print("KERNEL_OK")
</pallas_src>

<mosaic_0001>
module attributes {stable_mosaic.version = 11 : i64} {
  func.func @mha_kernel(%arg0: memref<2x8x32xf32, #tpu.memory_space<vmem>>, %arg1: memref<2x8x32xf32, #tpu.memory_space<vmem>>, %arg2: memref<2x8x32xf32, #tpu.memory_space<vmem>>, %arg3: memref<2x8x8xf32, #tpu.memory_space<vmem>>, %arg4: memref<3x32x32xbf16, #tpu.memory_space<vmem>>, %arg5: memref<3x1x32xf32, #tpu.memory_space<vmem>>, %arg6: memref<32x32xbf16, #tpu.memory_space<vmem>>, %arg7: memref<1x32xf32, #tpu.memory_space<vmem>>, %arg8: memref<2x8x32xf32, #tpu.memory_space<vmem>>, %arg9: memref<2x4x8x8xf32, #tpu.memory_space<vmem>>) attributes {dimension_semantics = [], scalar_prefetch = 0 : i64, scratch_operands = 0 : i64, tpu.core_type = #tpu.core_type<tc>} {
    %c0 = arith.constant 0 : index
    %c0_0 = arith.constant 0 : index
    %c0_1 = arith.constant 0 : index
    %0 = vector.load %arg0[%c0, %c0_0, %c0_1] : memref<2x8x32xf32, #tpu.memory_space<vmem>>, vector<2x8x32xf32>
    %1 = vector.shape_cast %0 : vector<2x8x32xf32> to vector<16x32xf32>
    %2 = arith.truncf %1 : vector<16x32xf32> to vector<16x32xbf16>
    %c0_2 = arith.constant 0 : index
    %c0_3 = arith.constant 0 : index
    %c0_4 = arith.constant 0 : index
    %3 = vector.load %arg4[%c0_2, %c0_3, %c0_4] : memref<3x32x32xbf16, #tpu.memory_space<vmem>>, vector<1x32x32xbf16>
    %4 = vector.shape_cast %3 : vector<1x32x32xbf16> to vector<32x32xbf16>
    %cst = arith.constant dense<0.000000e+00> : vector<16x32xf32>
    %5 = tpu.matmul %2, %4, %cst {dimension_numbers = #tpu.dot_dimension_numbers<[1], [0], [0], [1], [0, 0, 1, 1], [], []>} : vector<16x32xbf16>, vector<32x32xbf16>, vector<16x32xf32> -> vector<16x32xf32>
    %c0_5 = arith.constant 0 : index
    %c0_6 = arith.constant 0 : index
    %c0_7 = arith.constant 0 : index
    %6 = vector.load %arg5[%c0_5, %c0_6, %c0_7] : memref<3x1x32xf32, #tpu.memory_space<vmem>>, vector<1x1x32xf32>
    %7 = vector.shape_cast %6 : vector<1x1x32xf32> to vector<1x32xf32>
    %8 = vector.broadcast %7 : vector<1x32xf32> to vector<16x32xf32>
    %9 = arith.addf %5, %8 : vector<16x32xf32>
    %10 = vector.shape_cast %9 : vector<16x32xf32> to vector<2x8x4x8xf32>
    %11 = tpu.transpose %10, [0, 2, 1, 3] : vector<2x8x4x8xf32> -> vector<2x4x8x8xf32>
    %12 = vector.shape_cast %11 : vector<2x4x8x8xf32> to vector<8x8x8xf32>
    %c0_8 = arith.constant 0 : index
    %c0_9 = arith.constant 0 : index
    %c0_10 = arith.constant 0 : index
    %13 = vector.load %arg1[%c0_8, %c0_9, %c0_10] : memref<2x8x32xf32, #tpu.memory_space<vmem>>, vector<2x8x32xf32>
    %14 = vector.shape_cast %13 : vector<2x8x32xf32> to vector<16x32xf32>
    %15 = arith.truncf %14 : vector<16x32xf32> to vector<16x32xbf16>
    %c1 = arith.constant 1 : index
    %c0_11 = arith.constant 0 : index
    %c0_12 = arith.constant 0 : index
    %16 = vector.load %arg4[%c1, %c0_11, %c0_12] : memref<3x32x32xbf16, #tpu.memory_space<vmem>>, vector<1x32x32xbf16>
    %17 = vector.shape_cast %16 : vector<1x32x32xbf16> to vector<32x32xbf16>
    %cst_13 = arith.constant dense<0.000000e+00> : vector<16x32xf32>
    %18 = tpu.matmul %15, %17, %cst_13 {dimension_numbers = #tpu.dot_dimension_numbers<[1], [0], [0], [1], [0, 0, 1, 1], [], []>} : vector<16x32xbf16>, vector<32x32xbf16>, vector<16x32xf32> -> vector<16x32xf32>
    %c1_14 = arith.constant 1 : index
    %c0_15 = arith.constant 0 : index
    %c0_16 = arith.constant 0 : index
    %19 = vector.load %arg5[%c1_14, %c0_15, %c0_16] : memref<3x1x32xf32, #tpu.memory_space<vmem>>, vector<1x1x32xf32>
    %20 = vector.shape_cast %19 : vector<1x1x32xf32> to vector<1x32xf32>
    %21 = vector.broadcast %20 : vector<1x32xf32> to vector<16x32xf32>
    %22 = arith.addf %18, %21 : vector<16x32xf32>
    %23 = vector.shape_cast %22 : vector<16x32xf32> to vector<2x8x4x8xf32>
    %24 = tpu.transpose %23, [0, 2, 1, 3] : vector<2x8x4x8xf32> -> vector<2x4x8x8xf32>
    %25 = vector.shape_cast %24 : vector<2x4x8x8xf32> to vector<8x8x8xf32>
    %c0_17 = arith.constant 0 : index
    %c0_18 = arith.constant 0 : index
    %c0_19 = arith.constant 0 : index
    %26 = vector.load %arg2[%c0_17, %c0_18, %c0_19] : memref<2x8x32xf32, #tpu.memory_space<vmem>>, vector<2x8x32xf32>
    %27 = vector.shape_cast %26 : vector<2x8x32xf32> to vector<16x32xf32>
    %28 = arith.truncf %27 : vector<16x32xf32> to vector<16x32xbf16>
    %c2 = arith.constant 2 : index
    %c0_20 = arith.constant 0 : index
    %c0_21 = arith.constant 0 : index
    %29 = vector.load %arg4[%c2, %c0_20, %c0_21] : memref<3x32x32xbf16, #tpu.memory_space<vmem>>, vector<1x32x32xbf16>
    %30 = vector.shape_cast %29 : vector<1x32x32xbf16> to vector<32x32xbf16>
    %cst_22 = arith.constant dense<0.000000e+00> : vector<16x32xf32>
    %31 = tpu.matmul %28, %30, %cst_22 {dimension_numbers = #tpu.dot_dimension_numbers<[1], [0], [0], [1], [0, 0, 1, 1], [], []>} : vector<16x32xbf16>, vector<32x32xbf16>, vector<16x32xf32> -> vector<16x32xf32>
    %c2_23 = arith.constant 2 : index
    %c0_24 = arith.constant 0 : index
    %c0_25 = arith.constant 0 : index
    %32 = vector.load %arg5[%c2_23, %c0_24, %c0_25] : memref<3x1x32xf32, #tpu.memory_space<vmem>>, vector<1x1x32xf32>
    %33 = vector.shape_cast %32 : vector<1x1x32xf32> to vector<1x32xf32>
    %34 = vector.broadcast %33 : vector<1x32xf32> to vector<16x32xf32>
    %35 = arith.addf %31, %34 : vector<16x32xf32>
    %36 = vector.shape_cast %35 : vector<16x32xf32> to vector<2x8x4x8xf32>
    %37 = tpu.transpose %36, [0, 2, 1, 3] : vector<2x8x4x8xf32> -> vector<2x4x8x8xf32>
    %38 = vector.shape_cast %37 : vector<2x4x8x8xf32> to vector<8x8x8xf32>
    %39 = arith.truncf %12 : vector<8x8x8xf32> to vector<8x8x8xbf16>
    %40 = arith.truncf %25 : vector<8x8x8xf32> to vector<8x8x8xbf16>
    "tpu.trace_start"() <{level = 10 : i32, message = "nqd,nkd->nqk"}> : () -> ()
    %cst_26 = arith.constant dense<0.000000e+00> : vector<8x8x8xf32>
    %41 = tpu.matmul %39, %40, %cst_26 {dimension_numbers = #tpu.dot_dimension_numbers<[2], [2], [1], [1], [0, 0, 0, 1, 1, 1], [0], [0]>} : vector<8x8x8xbf16>, vector<8x8x8xbf16>, vector<8x8x8xf32> -> vector<8x8x8xf32>
    "tpu.trace_stop"() : () -> ()
    %42 = vector.shape_cast %41 : vector<8x8x8xf32> to vector<2x4x8x8xf32>
    %c0_27 = arith.constant 0 : index
    %c0_28 = arith.constant 0 : index
    %c0_29 = arith.constant 0 : index
    %43 = vector.load %arg3[%c0_27, %c0_28, %c0_29] : memref<2x8x8xf32, #tpu.memory_space<vmem>>, vector<2x8x8xf32>
    %44 = vector.shape_cast %43 : vector<2x8x8xf32> to vector<2x1x8x8xf32>
    %45 = vector.broadcast %44 : vector<2x1x8x8xf32> to vector<2x4x8x8xf32>
    %46 = arith.minimumf %42, %45 : vector<2x4x8x8xf32>
    %cst_30 = arith.constant dense<0xFF800000> : vector<2x4x8xf32>
    %47 = vector.multi_reduction <maximumf>, %46, %cst_30 [3] : vector<2x4x8x8xf32> to vector<2x4x8xf32>
    %48 = vector.shape_cast %47 : vector<2x4x8xf32> to vector<2x4x8x1xf32>
    %49 = vector.broadcast %48 : vector<2x4x8x1xf32> to vector<2x4x8x8xf32>
    %50 = arith.subf %46, %49 : vector<2x4x8x8xf32>
    %51 = math.exp %50 : vector<2x4x8x8xf32>
    %cst_31 = arith.constant dense<0.000000e+00> : vector<2x4x8xf32>
    %52 = vector.multi_reduction <add>, %51, %cst_31 [3] : vector<2x4x8x8xf32> to vector<2x4x8xf32>
    %53 = vector.shape_cast %52 : vector<2x4x8xf32> to vector<2x4x8x1xf32>
    %54 = vector.broadcast %53 : vector<2x4x8x1xf32> to vector<2x4x8x8xf32>
    %55 = arith.divf %51, %54 : vector<2x4x8x8xf32>
    %c0_32 = arith.constant 0 : index
    %c0_33 = arith.constant 0 : index
    %c0_34 = arith.constant 0 : index
    %c0_35 = arith.constant 0 : index
    %56 = vector.load %arg9[%c0_32, %c0_33, %c0_34, %c0_35] : memref<2x4x8x8xf32, #tpu.memory_space<vmem>>, vector<2x4x8x8xf32>
    tpu.vector_store %arg9[%c0_32, %c0_33, %c0_34, %c0_35], %55 {strides = array<i32>} : memref<2x4x8x8xf32, #tpu.memory_space<vmem>>, vector<2x4x8x8xf32>,
    %57 = vector.shape_cast %55 : vector<2x4x8x8xf32> to vector<8x8x8xf32>
    %58 = arith.truncf %57 : vector<8x8x8xf32> to vector<8x8x8xbf16>
    %59 = arith.truncf %38 : vector<8x8x8xf32> to vector<8x8x8xbf16>
    "tpu.trace_start"() <{level = 10 : i32, message = "nqk,nkd->nqd"}> : () -> ()
    %cst_36 = arith.constant dense<0.000000e+00> : vector<8x8x8xf32>
    %60 = tpu.matmul %58, %59, %cst_36 {dimension_numbers = #tpu.dot_dimension_numbers<[2], [1], [1], [2], [0, 0, 0, 1, 1, 2], [0], [0]>} : vector<8x8x8xbf16>, vector<8x8x8xbf16>, vector<8x8x8xf32> -> vector<8x8x8xf32>
    "tpu.trace_stop"() : () -> ()
    %61 = vector.shape_cast %60 : vector<8x8x8xf32> to vector<2x4x8x8xf32>
    %62 = tpu.transpose %61, [0, 2, 1, 3] : vector<2x4x8x8xf32> -> vector<2x8x4x8xf32>
    %63 = vector.shape_cast %62 : vector<2x8x4x8xf32> to vector<16x32xf32>
    %64 = arith.truncf %63 : vector<16x32xf32> to vector<16x32xbf16>
    %c0_37 = arith.constant 0 : index
    %c0_38 = arith.constant 0 : index
    %65 = vector.load %arg6[%c0_37, %c0_38] : memref<32x32xbf16, #tpu.memory_space<vmem>>, vector<32x32xbf16>
    %cst_39 = arith.constant dense<0.000000e+00> : vector<16x32xf32>
    %66 = tpu.matmul %64, %65, %cst_39 {dimension_numbers = #tpu.dot_dimension_numbers<[1], [0], [0], [1], [0, 0, 1, 1], [], []>} : vector<16x32xbf16>, vector<32x32xbf16>, vector<16x32xf32> -> vector<16x32xf32>
    %c0_40 = arith.constant 0 : index
    %c0_41 = arith.constant 0 : index
    %67 = vector.load %arg7[%c0_40, %c0_41] : memref<1x32xf32, #tpu.memory_space<vmem>>, vector<1x32xf32>
    %68 = vector.broadcast %67 : vector<1x32xf32> to vector<16x32xf32>
    %69 = arith.addf %66, %68 : vector<16x32xf32>
    %70 = vector.shape_cast %69 : vector<16x32xf32> to vector<2x8x32xf32>
    %c0_42 = arith.constant 0 : index
    %c0_43 = arith.constant 0 : index
    %c0_44 = arith.constant 0 : index
    %71 = vector.load %arg8[%c0_42, %c0_43, %c0_44] : memref<2x8x32xf32, #tpu.memory_space<vmem>>, vector<2x8x32xf32>
    tpu.vector_store %arg8[%c0_42, %c0_43, %c0_44], %70 {strides = array<i32>} : memref<2x8x32xf32, #tpu.memory_space<vmem>>, vector<2x8x32xf32>,
    return
  }
}

</mosaic_0001>

<bundles_post_ra>
// kernel: multi_head_attention.1
= control target key start
LH: loop header
LB: loop body
LE: loop exit
PB: predicated region body
PF: predicated region fallthrough
CT: control target
= control target key end

     0   :  { %15 = vsyncpa [#allocation3], 0  ;;  %s2789_s0 = inlined_call_operand.vmem [shape: f32[2,8,32], index: 0, kind: input, shape index: {}]   ;;  %s2790_s1 = inlined_call_operand.vmem [shape: f32[2,8,32], index: 1, kind: input, shape index: {}]   ;;  %s2791_s2 = inlined_call_operand.hbm [shape: f32[2,8,32], index: 2, kind: input, shape index: {}]   ;;  %s2792_s3 = inlined_call_operand.vmem [shape: f32[2,8,8], index: 3, kind: input, shape index: {}]   ;;  %s2793_s4 = inlined_call_operand.hbm [shape: bf16[3,32,32], index: 4, kind: input, shape index: {}]   ;;  %s2794_s5 = inlined_call_operand.vmem [shape: f32[3,1,32], index: 5, kind: input, shape index: {}]   ;;  %s2795_s6 = inlined_call_operand.hbm [shape: bf16[32,32], index: 6, kind: input, shape index: {}]   ;;  %s2796_s7 = inlined_call_operand.vmem [shape: f32[1,32], index: 7, kind: input, shape index: {}]   ;;  %s2797_s8 = inlined_call_operand.hbm [shape: f32[2,8,32], index: 8, kind: output, shape index: {0}]   ;;  %s2798_s9 = inlined_call_operand.hbm [shape: f32[2,4,8,8], index: 9, kind: output, shape index: {1}]  }
   0x1   :  { %16 = vsyncpa [#allocation6], 0 }
   0x2   :  { %17 = vsyncpa [#allocation4], 0  ;;  %s42_s11 = sshll.u32 %s2793_s4, 4  ;;  %s43_s11 = int_to_ptr.hbm [resolvable:$true] %s42_s11 }
   0x3   :  { %18 = vsyncpa [#allocation10], 0  ;;  %s2082_s12 = smov [#allocation5]   ;;  %s27_s16 = sshll.u32 %s2791_s2, 4  ;;  %s28_s16 = int_to_ptr.hbm [resolvable:$true] %s27_s16 }
   0x4   :  { %s44_s13 = sshll.u32 %s2082_s12, 4  ;;  %s2083_s17 = smov 64   ;;  %s45_s13 = int_to_ptr.vmem [resolvable:$true] %s44_s13 }
   0x5   :  { %s2084_s18 = smov 4   ;;  %s2085_s19 = smov [#allocation2]  }
   0x6   :  { %50 = dma.hbm_to_vmem [thread:$0]  %s43_s11, 768, %s45_s13, [#allocation6], %s2083_s17, %s2083_s17, %s2084_s18  }
   0x7   :  { %s29_s20 = sshll.u32 %s2085_s19, 4  ;;  %s2086_s21 = smov 128   ;;  %s30_s20 = int_to_ptr.vmem [resolvable:$true] %s29_s20 }
   0x8   :  { %s2087_s22 = smov 8   ;;  %s57_s24 = sshll.u32 %s2795_s6, 4  ;;  %s58_s24 = int_to_ptr.hbm [resolvable:$true] %s57_s24 }
   0x9   :  { %35 = dma.hbm_to_vmem [thread:$0]  %s28_s16, 256, %s30_s20, [#allocation3], %s2086_s21, %s2086_s21, %s2087_s22  }
   0xa   :  { %s2088_s25 = smov [#allocation7]  }
   0xb   :  { %s59_s2 = sshll.u32 %s2088_s25, 4  ;;  %s60_s2 = int_to_ptr.vmem [resolvable:$true] %s59_s2 }
   0xc   :  { %65 = dma.hbm_to_vmem [thread:$0]  %s58_s24, 256, %s60_s2, [#allocation6], %s2083_s17, %s2083_s17, %s2084_s18  }
   0xd   :  { %2074 = dma.done.wait [#allocation3], 256  }
   0xe   :  { %2075 = vsyncadd [#allocation3], 4294967040 }
   0xf   :  { %2076 = dma.done.wait [#allocation6], 1024  }
  0x10   :  { %2077 = vsyncadd [#allocation6], 4294966272  ;;  %v1860_v0 = vld [vmem:[#allocation5 + $0x8] sm:$0xff]  ;;  %v1862_v1 = vld [vmem:[#allocation5 + $0x18] sm:$0xff]  ;;  %vm104_vm0 = vcmask 261120   ;;  %s2090_s15 = smov 120  }
  0x11   :  { %v1859_v2 = vld [vmem:[#allocation5] sm:$0xff]  ;;  %v1861_v3 = vld [vmem:[#allocation5 + $0x10] sm:$0xff]  ;;  %v82_v5 = vld [vmem:[%s2789_s0 + $0x8] sm:$0xff]  ;;  %114 = vmatpush.bf16.msra.mxu0 %v1860_v0  ;;  %397 = vmatpush.bf16.msra.mxu1 %v1862_v1  ;;  %s2091_s16 = smov 112   ;;  %v2092_v25 = vmov 1983009808  }
  0x12   :  { %v81_v4 = vld [vmem:[%s2789_s0] sm:$0xff]  ;;  %v364_v7 = vld [vmem:[%s2790_s1 + $0x8] sm:$0xff]  ;;  %v1864_v22 = vld [vmem:[#allocation5 + $0x28] sm:$0xff]  ;;  %v148_v26 = vunpack.c.l.s4 %v2092_v25  ;;  %vm143_vm1 = vcmask 1047556   ;;  %v2093_v37 = vmov 1934713408  }
  0x13   :  { %v363_v6 = vld [vmem:[%s2790_s1] sm:$0xff]  ;;  %v83_v8 = vpack.c.bf16 %v82_v5, %v81_v4  ;;  %s2089_s1 = smov 104   ;;  %679 = vmatpush.bf16.msra.mxu2 %v1864_v22  ;;  %v1863_v23 = vld [vmem:[#allocation5 + $0x20] sm:$0xff]  ;;  %v646_v28 = vld [vmem:[#allocation2 + $0x8] sm:$0xff]  ;;  %v172_v38 = vunpack.c.l.s4 %v2093_v37  ;;  %vm943_vm2 = vcmask 64512   ;;  %vm1325_vm3 = vcmask 1043456  }
  0x14   :  { %v365_v9 = vpack.c.bf16 %v364_v7, %v363_v6  ;;  %v1918_v10 = vld [vmem:[%s2794_s5] ss:$0 sm:$0xff]  ;;  %v1919_v11 = vld [vmem:[%s2794_s5 + $0x1] ss:$0 sm:$0xff]  ;;  %v2214_v33 = vunpack.c.0.s8 %v148_v26  ;;  %s2095_s23 = smov 16   ;;  %s2096_s24 = smov [#allocation9]  }
  0x15   :  { %115 = vmatpush.bf16.msra.mxu0 %v1859_v2  ;;  %398 = vmatpush.bf16.msra.mxu1 %v1861_v3  ;;  %v645_v27 = vld [vmem:[#allocation2] sm:$0xff]  ;;  %v2226_v50 = vunpack.c.0.s8 %v172_v38  ;;  %s1784_s25 = sshll.u32 %s2096_s24, 4  ;;  %s1786_s27 = sshll.u32 %s2798_s9, 4  ;;  %s1785_s25 = int_to_ptr.vmem [resolvable:$true] %s1784_s25  ;;  %s1787_s27 = int_to_ptr.hbm [resolvable:$true] %s1786_s27 }
  0x16   :  { %v647_v30 = vpack.c.bf16 %v646_v28, %v645_v27  ;;  %s2097_s6 = smov [#allocation8]   ;;  %s1773_s9 = sshll.u32 %s2797_s8, 4  ;;  %s1774_s9 = int_to_ptr.hbm [resolvable:$true] %s1773_s9 }
  0x17   :  { %680 = vmatpush.bf16.msra.mxu2 %v1863_v23  ;;  %s1771_s30 = sshll.u32 %s2097_s6, 4  ;;  %s1772_s30 = int_to_ptr.vmem [resolvable:$true] %s1771_s30 }
  0x18   :  { %1813 = vmatmul.msk.bf16.vlgmr.msra.gmra.mxu0 %vm104_vm0, %v83_v8  ;;  %1823 = vmatmul.msk.bf16.vlgmr.msra.gmra.mxu1 %vm104_vm0, %v365_v9 }
  0x1a   :  { %1833 = vmatmul.msk.bf16.vlgmr.msra.gmra.mxu2 %vm104_vm0, %v647_v30 }
  0x95   :  { %v117_v12 = vpop.f32.mrf.mxu0  ;;  %v400_v13 = vpop.f32.mrf.mxu1 }
  0x96   :  { %v2180_v14 = vadd.f32 %v1918_v10, %v117_v12  ;;  %v2182_v15 = vadd.f32 %v1919_v11, %v400_v13 }
  0x98   :  { %419 = vrot.lane.b32.xlu1 %v2182_v15, %s2089_s1  ;;  %136 = vrot.lane.b32.xlu2 %v2180_v14, %s2089_s1  ;;  %v1883_v16 = vpack.i.bf16 %v2180_v14, %v2182_v15  ;;  %v145_v43 = vrot.slane %v2180_v14, 4  ;;  %v427_v48 = vrot.slane %v2182_v15, 4 }
  0x9a   :  { %1884 = vrot.lane.b32.xlu0 %v1883_v16, %s2090_s15 }
  0x9d   :  { %v402_v17 = vpop.f32.mrf.mxu1  ;;  %v119_v19 = vpop.f32.mrf.mxu0 }
  0x9e   :  { %v2191_v18 = vadd.f32 %v1919_v11, %v402_v17  ;;  %v2199_v20 = vadd.f32 %v1918_v10, %v119_v19 }
  0xa0   :  { %409 = vrot.lane.b32.xlu2 %v2191_v18, %s2090_s15  ;;  %130 = vrot.lane.b32.xlu1 %v2180_v14, %s2091_s16  ;;  %v483_v52 = vrot.slane %v2191_v18, 4  ;;  %v201_v53 = vrot.slane %v2199_v20, 4 }
  0xa2   :  { %413 = vrot.lane.b32.xlu0 %v2182_v15, %s2091_s16 }
  0xa8   :  { %126 = vrot.lane.b32.xlu2 %v2199_v20, %s2090_s15  ;;  %421 = vrot.lane.b32.xlu1 %v2191_v18, %s2089_s1 }
  0xaa   :  { %415 = vrot.lane.b32.xlu0 %v2191_v18, %s2091_s16 }
  0xb0   :  { %138 = vrot.lane.b32.xlu1 %v2199_v20, %s2089_s1 }
  0xb2   :  { %132 = vrot.lane.b32.xlu0 %v2199_v20, %s2091_s16 }
  0xf2   :  { %v137_v21 = vpop.permute.xlu2 %136 }
  0xf3   :  { %v155_v32 = vrot.slane %v137_v21, 4 }
  0xfa   :  { %v2211_v24 = vpop.permute.xlu2 %409 }
  0xfb   :  { %v495_v58 = vrot.slane %v2211_v24, 4 }
 0x102   :  { %v2219_v44 = vpop.permute.xlu2 %126 }
 0x103   :  { %v213_v59 = vrot.slane %v2219_v44, 4 }
 0x10a   :  { %v420_v29 = vpop.permute.xlu1 %419 }
 0x10b   :  { %v437_v36 = vrot.slane %v420_v29, 4 }
 0x10c   :  { %v1885_v31 = vpop.permute.xlu0 %1884 }
 0x10d   :  { %v1887_v34 = vunpack.i.h.bf16 %v1885_v31  ;;  %v1886_v35 = vunpack.i.l.bf16 %v1885_v31 }
 0x10f   :  { %v156_v39 = vsel %vm143_vm1, %v155_v32, %v1887_v34  ;;  %v157_v40 = vrot.slane %v1887_v34, 4  ;;  %v439_v41 = vrot.slane %v1886_v35, 4  ;;  %v438_v42 = vsel %vm143_vm1, %v437_v36, %v1886_v35 }
 0x110   :  { %v162_v46 = vperm.slane %v156_v39, %v2214_v33  ;;  %v444_v54 = vperm.slane %v438_v42, %v2214_v33 }
 0x111   :  { %v158_v45 = vsel %vm143_vm1, %v137_v21, %v157_v40  ;;  %v440_v47 = vsel %vm143_vm1, %v420_v29, %v439_v41 }
 0x112   :  { %v166_v49 = vperm.slane %v158_v45, %v2214_v33  ;;  %v131_v51 = vpop.permute.xlu1 %130  ;;  %v448_v55 = vperm.slane %v440_v47, %v2214_v33  ;;  %v167_v63 = vrot.slane %v162_v46, 4  ;;  %v449_v7 = vrot.slane %v444_v54, 4 }
 0x113   :  { %v142_v56 = vrot.slane %v131_v51, 4  ;;  %v146_v57 = vsel %vm143_vm1, %v131_v51, %v145_v43 }
 0x114   :  { %v179_v60 = vrot.slane %v166_v49, 4  ;;  %v154_v61 = vperm.slane %v146_v57, %v2214_v33  ;;  %v414_v62 = vpop.permute.xlu0 %413  ;;  %v461_v8 = vrot.slane %v448_v55, 4 }
 0x115   :  { %v144_v0 = vsel %vm143_vm1, %v142_v56, %v2180_v14  ;;  %v425_v1 = vrot.slane %v414_v62, 4  ;;  %v428_v2 = vsel %vm143_vm1, %v414_v62, %v427_v48 }
 0x116   :  { %v150_v3 = vperm.slane %v144_v0, %v2214_v33  ;;  %v180_v4 = vsel %vm143_vm1, %v179_v60, %v154_v61  ;;  %v181_v5 = vrot.slane %v154_v61, 4  ;;  %v436_v6 = vperm.slane %v428_v2, %v2214_v33 }
 0x117   :  { %v186_v9 = vperm.slane %v180_v4, %v2226_v50  ;;  %v426_v10 = vsel %vm143_vm1, %v425_v1, %v2182_v15 }
 0x118   :  { %v168_v11 = vsel %vm143_vm1, %v167_v63, %v150_v3  ;;  %v169_v12 = vrot.slane %v150_v3, 4  ;;  %v182_v13 = vsel %vm143_vm1, %v166_v49, %v181_v5  ;;  %v432_v14 = vperm.slane %v426_v10, %v2214_v33 }
 0x119   :  { %v174_v16 = vperm.slane %v168_v11, %v2226_v50  ;;  %v190_v17 = vperm.slane %v182_v13, %v2226_v50  ;;  %v195_v19 = vrot.slane %v186_v9, 4  ;;  %v462_v21 = vsel %vm143_vm1, %v461_v8, %v436_v6 }
 0x11a   :  { %v170_v22 = vsel %vm143_vm1, %v162_v46, %v169_v12  ;;  %v450_v23 = vsel %vm143_vm1, %v449_v7, %v432_v14  ;;  %v451_v25 = vrot.slane %v432_v14, 4  ;;  %v463_v15 = vrot.slane %v436_v6, 4  ;;  %v422_v26 = vpop.permute.xlu1 %421 }
 0x11b   :  { %v178_v27 = vperm.slane %v170_v22, %v2226_v50  ;;  %v191_v28 = vrot.slane %v174_v16, 4  ;;  %v196_v29 = vsel %vm143_vm1, 0.0, %v195_v19  ;;  %v197_v30 = vrot.slane %v190_v17, 4 }
 0x11c   :  { %v452_v31 = vsel %vm143_vm1, %v444_v54, %v451_v25  ;;  %v2257_v32 = vperm.slane %v450_v23, %v2226_v50  ;;  %v464_v34 = vsel %vm143_vm1, %v448_v55, %v463_v15  ;;  %v468_v35 = vperm.slane %v462_v21, %v2226_v50  ;;  %v416_v36 = vpop.permute.xlu0 %415 }
 0x11d   :  { %v2262_v37 = vsel %vm143_vm1, 0.0, %v191_v28  ;;  %v193_v38 = vrot.slane %v178_v27, 4  ;;  %v198_v39 = vsel %vm143_vm1, 0.0, %v197_v30  ;;  %v266_v40 = vsel %vm143_vm1, %v197_v30, %v186_v9 }
 0x11e   :  { %v2267_v41 = vperm.slane %v266_v40, %v2214_v33  ;;  %v271_v42 = vrot.slane %v198_v39, 4  ;;  %v460_v43 = vperm.slane %v452_v31, %v2226_v50  ;;  %v472_v45 = vperm.slane %v464_v34, %v2226_v50 }
 0x11f   :  { %v2272_v46 = vsel %vm143_vm1, 0.0, %v193_v38  ;;  %v255_v47 = vsel %vm143_vm1, %v193_v38, %v174_v16  ;;  %v473_v48 = vrot.slane %v2257_v32, 4  ;;  %v477_v49 = vrot.slane %v468_v35, 4 }
 0x120   :  { %v2277_v51 = vperm.slane %v255_v47, %v2214_v33  ;;  %v260_v54 = vrot.slane %v2272_v46, 4  ;;  %v272_v55 = vsel %vm143_vm1, %v271_v42, %v196_v29  ;;  %v291_v56 = vrot.slane %v2267_v41, 4 }
 0x121   :  { %v2283_v57 = vperm.slane %v272_v55, %v2214_v33  ;;  %v475_v60 = vrot.slane %v460_v43, 4  ;;  %v478_v61 = vsel %vm143_vm1, 0.0, %v477_v49  ;;  %v479_v62 = vrot.slane %v472_v45, 4 }
 0x122   :  { %v493_v63 = vrot.slane %v422_v26, 4  ;;  %v496_v0 = vsel %vm143_vm1, %v422_v26, %v495_v58  ;;  %v481_v1 = vrot.slane %v416_v36, 4  ;;  %v484_v2 = vsel %vm143_vm1, %v416_v36, %v483_v52  ;;  %v139_v7 = vpop.permute.xlu1 %138 }
 0x123   :  { %v2291_v3 = vsel %vm143_vm1, 0.0, %v475_v60  ;;  %v480_v4 = vsel %vm143_vm1, 0.0, %v479_v62  ;;  %v548_v5 = vsel %vm143_vm1, %v479_v62, %v468_v35  ;;  %v504_v6 = vperm.slane %v496_v0, %v2214_v33 }
 0x124   :  { %v542_v8 = vrot.slane %v2291_v3, 4  ;;  %v2298_v9 = vperm.slane %v548_v5, %v2214_v33  ;;  %v553_v58 = vrot.slane %v480_v4, 4  ;;  %v494_v10 = vsel %vm143_vm1, %v493_v63, %v2211_v24  ;;  %v133_v14 = vpop.permute.xlu0 %132 }
 0x125   :  { %v500_v52 = vperm.slane %v494_v10, %v2214_v33  ;;  %v517_v11 = vrot.slane %v504_v6, 4  ;;  %v482_v12 = vsel %vm143_vm1, %v481_v1, %v2191_v18  ;;  %v492_v13 = vperm.slane %v484_v2, %v2214_v33 }
 0x126   :  { %v554_v16 = vsel %vm143_vm1, %v553_v58, %v478_v61  ;;  %v488_v17 = vperm.slane %v482_v12, %v2214_v33  ;;  %v211_v19 = vrot.slane %v139_v7, 4  ;;  %v214_v21 = vsel %vm143_vm1, %v139_v7, %v213_v59 }
 0x127   :  { %v505_v22 = vrot.slane %v500_v52, 4  ;;  %v518_v24 = vsel %vm143_vm1, %v517_v11, %v492_v13  ;;  %v519_v23 = vrot.slane %v492_v13, 4  ;;  %v222_v25 = vperm.slane %v214_v21, %v2214_v33 }
 0x128   :  { %v507_v15 = vrot.slane %v488_v17, 4  ;;  %v524_v18 = vperm.slane %v518_v24, %v2226_v50  ;;  %v212_v26 = vsel %vm143_vm1, %v211_v19, %v2219_v44  ;;  %v199_v27 = vrot.slane %v133_v14, 4 }
 0x129   :  { %v506_v28 = vsel %vm143_vm1, %v505_v22, %v488_v17  ;;  %v520_v29 = vsel %vm143_vm1, %v504_v6, %v519_v23  ;;  %v218_v30 = vperm.slane %v212_v26, %v2214_v33  ;;  %v235_v59 = vrot.slane %v222_v25, 4 }
 0x12a   :  { %v508_v31 = vsel %vm143_vm1, %v500_v52, %v507_v15  ;;  %v512_v34 = vperm.slane %v506_v28, %v2226_v50  ;;  %v528_v35 = vperm.slane %v520_v29, %v2226_v50  ;;  %v533_v36 = vrot.slane %v524_v18, 4 }
 0x12b   :  { %v516_v38 = vperm.slane %v508_v31, %v2226_v50  ;;  %v223_v39 = vrot.slane %v218_v30, 4  ;;  %v200_v44 = vsel %vm143_vm1, %v199_v27, %v2199_v20  ;;  %v202_v40 = vsel %vm143_vm1, %v133_v14, %v201_v53 }
 0x12c   :  { %v529_v42 = vrot.slane %v512_v34, 4  ;;  %v534_v43 = vsel %vm143_vm1, 0.0, %v533_v36  ;;  %v535_v45 = vrot.slane %v528_v35, 4  ;;  %v206_v47 = vperm.slane %v200_v44, %v2214_v33 }
 0x12d   :  { %v531_v49 = vrot.slane %v516_v38, 4  ;;  %v210_v55 = vperm.slane %v202_v40, %v2214_v33  ;;  %v474_v61 = vsel %vm143_vm1, 0.0, %v473_v48  ;;  %v537_v62 = vsel %vm143_vm1, %v475_v60, %v2257_v32 }
 0x12e   :  { %v2335_v63 = vsel %vm143_vm1, 0.0, %v529_v42  ;;  %v536_v20 = vsel %vm143_vm1, 0.0, %v535_v45  ;;  %v602_v53 = vsel %vm143_vm1, %v535_v45, %v524_v18  ;;  %v224_v0 = vsel %vm143_vm1, %v223_v39, %v206_v47 }
 0x12f   :  { %v2341_v1 = vsel %vm143_vm1, 0.0, %v531_v49  ;;  %v2344_v2 = vsel %vm143_vm1, %v531_v49, %v512_v34  ;;  %v2347_v48 = vperm.slane %v602_v53, %v2214_v33  ;;  %v607_v4 = vrot.slane %v536_v20, 4 }
 0x130   :  { %v596_v32 = vrot.slane %v2341_v1, 4  ;;  %v225_v60 = vrot.slane %v206_v47, 4  ;;  %v230_v5 = vperm.slane %v224_v0, %v2226_v50  ;;  %v236_v6 = vsel %vm143_vm1, %v235_v59, %v210_v55 }
 0x131   :  { %v608_v7 = vsel %vm143_vm1, %v607_v4, %v534_v43  ;;  %v627_v58 = vrot.slane %v2347_v48, 4  ;;  %v237_v10 = vrot.slane %v210_v55, 4  ;;  %v242_v52 = vperm.slane %v236_v6, %v2226_v50 }
 0x132   :  { %v2356_v11 = vperm.slane %v608_v7, %v2214_v33  ;;  %v226_v12 = vsel %vm143_vm1, %v218_v30, %v225_v60  ;;  %v247_v13 = vrot.slane %v230_v5, 4  ;;  %v541_v14 = vperm.slane %v537_v62, %v2214_v33 }
 0x133   :  { %v234_v17 = vperm.slane %v226_v12, %v2226_v50  ;;  %v238_v19 = vsel %vm143_vm1, %v222_v25, %v237_v10  ;;  %v251_v21 = vrot.slane %v242_v52, 4  ;;  %v543_v22 = vsel %vm143_vm1, %v542_v8, %v474_v61 }
 0x134   :  { %v246_v24 = vperm.slane %v238_v19, %v2226_v50  ;;  %v248_v23 = vsel %vm143_vm1, 0.0, %v247_v13  ;;  %v547_v15 = vperm.slane %v543_v22, %v2214_v33  ;;  %v558_v18 = vperm.slane %v554_v16, %v2214_v33 }
 0x135   :  { %v249_v26 = vrot.slane %v234_v17, 4  ;;  %v252_v27 = vsel %vm143_vm1, 0.0, %v251_v21  ;;  %v561_v28 = vrot.slane %v541_v14, 4  ;;  %v573_v29 = vrot.slane %v2298_v9, 4 }
 0x136   :  { %v253_v25 = vrot.slane %v246_v24, 4  ;;  %v559_v30 = vrot.slane %v547_v15, 4  ;;  %v571_v3 = vrot.slane %v558_v18, 4  ;;  %v279_v6 = vrot.slane %v2277_v51, 4 }
 0x137   :  { %v250_v8 = vsel %vm143_vm1, 0.0, %v249_v26  ;;  %v309_v59 = vsel %vm143_vm1, %v249_v26, %v230_v5  ;;  %v562_v31 = vsel %vm143_vm1, %v547_v15, %v561_v28  ;;  %v574_v34 = vsel %vm143_vm1, %v558_v18, %v573_v29 }
 0x138   :  { %v254_v16 = vsel %vm143_vm1, 0.0, %v253_v25  ;;  %v2377_v35 = vperm.slane %v309_v59, %v2214_v33  ;;  %v314_v36 = vrot.slane %v250_v8, 4  ;;  %v320_v38 = vsel %vm143_vm1, %v253_v25, %v242_v52 }
 0x139   :  { %v2381_v39 = vperm.slane %v320_v38, %v2214_v33  ;;  %v325_v44 = vrot.slane %v254_v16, 4  ;;  %v570_v40 = vperm.slane %v562_v31, %v2226_v50  ;;  %v582_v42 = vperm.slane %v574_v34, %v2226_v50 }
 0x13a   :  { %v315_v43 = vsel %vm143_vm1, %v314_v36, %v248_v23  ;;  %v333_v45 = vrot.slane %v2377_v35, 4  ;;  %v560_v47 = vsel %vm143_vm1, %v559_v30, %v541_v14  ;;  %v572_v49 = vsel %vm143_vm1, %v571_v3, %v2298_v9 }
 0x13b   :  { %v2391_v55 = vperm.slane %v315_v43, %v2214_v33  ;;  %v326_v61 = vsel %vm143_vm1, %v325_v44, %v252_v27  ;;  %v345_v62 = vrot.slane %v2381_v39, 4  ;;  %v587_v20 = vrot.slane %v582_v42, 4 }
 0x13c   :  { %v2396_v53 = vperm.slane %v326_v61, %v2214_v33  ;;  %v566_v0 = vperm.slane %v560_v47, %v2226_v50  ;;  %v578_v4 = vperm.slane %v572_v49, %v2226_v50  ;;  %v589_v60 = vrot.slane %v570_v40, 4 }
 0x13d   :  { %v588_v5 = vsel %vm143_vm1, %v587_v20, %v570_v40  ;;  %v261_v9 = vsel %vm143_vm1, %v260_v54, %v2262_v37  ;;  %v292_v7 = vsel %vm143_vm1, %v2283_v57, %v291_v56  ;;  %v595_v21 = vperm.slane %v2344_v2, %v2214_v33 }
 0x13e   :  { %v343_v10 = vrot.slane %v2396_v53, 4  ;;  %v937_v52 = vpack.c.bf16 %v588_v5, %v588_v5  ;;  %v583_v12 = vrot.slane %v578_v4, 4  ;;  %v590_v13 = vsel %vm143_vm1, %v582_v42, %v589_v60 }
 0x13f   :  { %v938_v14 = vpack.c.bf16 %v590_v13, %v590_v13  ;;  %v585_v17 = vrot.slane %v566_v0, 4  ;;  %v265_v19 = vperm.slane %v261_v9, %v2214_v33  ;;  %v300_v46 = vperm.slane %v292_v7, %v2226_v50 }
 0x140   :  { %v986_v37 = vsel %vm943_vm2, %v937_v52, 0  ;;  %v584_v54 = vsel %vm143_vm1, %v583_v12, %v566_v0  ;;  %v597_v56 = vsel %vm143_vm1, %v596_v32, %v2335_v63  ;;  %v615_v1 = vrot.slane %v595_v21, 4 }
 0x141   :  { %995 = vmatpush.bf16.xpose.msrb.mxu1 %v986_v37  ;;  %v935_v22 = vpack.c.bf16 %v584_v54, %v584_v54  ;;  %v1005_v24 = vsel %vm943_vm2, %v938_v14, 0  ;;  %v586_v23 = vsel %vm143_vm1, %v578_v4, %v585_v17  ;;  %v280_v15 = vsel %vm143_vm1, %v265_v19, %v279_v6 }
 0x142   :  { %1014 = vmatpush.bf16.xpose.msrb.mxu2 %v1005_v24  ;;  %v936_v18 = vpack.c.bf16 %v586_v23, %v586_v23  ;;  %v288_v26 = vperm.slane %v280_v15, %v2226_v50  ;;  %v305_v27 = vrot.slane %v300_v46, 4  ;;  %v601_v2 = vperm.slane %v597_v56, %v2214_v33 }
 0x143   :  { %v948_v28 = vsel %vm943_vm2, %v935_v22, 0  ;;  %v628_v63 = vsel %vm143_vm1, %v2356_v11, %v627_v58  ;;  %v277_v32 = vrot.slane %v265_v19, 4  ;;  %v289_v3 = vrot.slane %v2283_v57, 4 }
 0x144   :  { %957 = vmatpush.bf16.xpose.msra.mxu3 %v948_v28  ;;  %v967_v29 = vsel %vm943_vm2, %v936_v18, 0  ;;  %v306_v25 = vsel %vm143_vm1, %v305_v27, %v288_v26  ;;  %v636_v30 = vperm.slane %v628_v63, %v2226_v50  ;;  %v616_v59 = vsel %vm143_vm1, %v601_v2, %v615_v1 }
 0x145   :  { %976 = vmatpush.bf16.xpose.msrb.mxu0 %v967_v29  ;;  %v929_v8 = vpack.c.bf16 %v306_v25, %v306_v25  ;;  %v278_v31 = vsel %vm143_vm1, %v277_v32, %v2277_v51  ;;  %v307_v34 = vrot.slane %v288_v26, 4  ;;  %v624_v58 = vperm.slane %v616_v59, %v2226_v50  ;;  %v682_v25 = vpop.f32.mrf.mxu2 }
 0x146   :  { %v641_v16 = vrot.slane %v636_v30, 4  ;;  %v284_v36 = vperm.slane %v278_v31, %v2226_v50  ;;  %v290_v38 = vsel %vm143_vm1, %v289_v3, %v2267_v41  ;;  %v613_v40 = vrot.slane %v601_v2, 4 }
 0x147   :  { %v296_v44 = vperm.slane %v290_v38, %v2226_v50  ;;  %v308_v57 = vsel %vm143_vm1, %v300_v46, %v307_v34  ;;  %v625_v42 = vrot.slane %v2356_v11, 4  ;;  %v643_v49 = vrot.slane %v624_v58, 4 }
 0x148   :  { %1836 = vmatmul.msk.bf16.vlgmr.msrb.gmra.mxu1 %vm943_vm2, %v929_v8  ;;  %v642_v51 = vsel %vm143_vm1, %v641_v16, %v624_v58  ;;  %v303_v43 = vrot.slane %v284_v36, 4  ;;  %v930_v47 = vpack.c.bf16 %v308_v57, %v308_v57  ;;  %v614_v0 = vsel %vm143_vm1, %v613_v40, %v595_v21 }
 0x149   :  { %v941_v61 = vpack.c.bf16 %v642_v51, %v642_v51  ;;  %v301_v20 = vrot.slane %v296_v44, 4  ;;  %v626_v41 = vsel %vm143_vm1, %v625_v42, %v2347_v48  ;;  %v620_v4 = vperm.slane %v614_v0, %v2226_v50 }
 0x14a   :  { %1837 = vmatmul.msk.bf16.vlgmr.msrb.gmra.mxu2 %vm943_vm2, %v930_v47  ;;  %v632_v11 = vperm.slane %v626_v41, %v2226_v50  ;;  %v644_v60 = vsel %vm143_vm1, %v636_v30, %v643_v49  ;;  %v304_v5 = vsel %vm143_vm1, %v296_v44, %v303_v43  ;;  %v334_v14 = vsel %vm143_vm1, %v2391_v55, %v333_v45  ;;  %v1096_v30 = vld [vmem:[%s2792_s3] sm:$0xff]  ;;  %v1097_v43 = vld [vmem:[%s2792_s3 + $0x8] sm:$0xff] }
 0x14b   :  { %v1062_v9 = vsel %vm943_vm2, %v941_v61, 0  ;;  %v302_v6 = vsel %vm143_vm1, %v301_v20, %v284_v36  ;;  %v942_v7 = vpack.c.bf16 %v644_v60, %v644_v60  ;;  %v928_v52 = vpack.c.bf16 %v304_v5, %v304_v5 }
 0x14c   :  { %1071 = vmatpush.bf16.xpose.msra.mxu1 %v1062_v9  ;;  %v927_v12 = vpack.c.bf16 %v302_v6, %v302_v6  ;;  %v637_v13 = vrot.slane %v632_v11, 4  ;;  %v639_v48 = vrot.slane %v620_v4, 4  ;;  %v342_v19 = vperm.slane %v334_v14, %v2226_v50 }
 0x14d   :  { %v1081_v17 = vsel %vm943_vm2, %v942_v7, 0  ;;  %1835 = vmatmul.msk.bf16.vlgmr.msrb.gmra.mxu0 %vm943_vm2, %v928_v52  ;;  %v346_v46 = vsel %vm143_vm1, %v2396_v53, %v345_v62  ;;  %v331_v37 = vrot.slane %v2391_v55, 4  ;;  %v344_v62 = vsel %vm143_vm1, %v343_v10, %v2381_v39  ;;  %v684_v3 = vpop.f32.mrf.mxu2 }
 0x14e   :  { %1834 = vmatmul.msk.bf16.vlgmr.msra.gmra.mxu3 %vm943_vm2, %v927_v12  ;;  %v638_v54 = vsel %vm143_vm1, %v637_v13, %v620_v4  ;;  %1090 = vmatpush.bf16.xpose.msra.mxu2 %v1081_v17  ;;  %v640_v45 = vsel %vm143_vm1, %v632_v11, %v639_v48  ;;  %v354_v21 = vperm.slane %v346_v46, %v2226_v50  ;;  %v361_v27 = vrot.slane %v342_v19, 4  ;;  %v1920_v17 = vld [vmem:[%s2794_s5 + $0x2] ss:$0 sm:$0xff]  ;;  %s2094_s5 = smov 24  }
 0x14f   :  { %v939_v56 = vpack.c.bf16 %v638_v54, %v638_v54  ;;  %v940_v22 = vpack.c.bf16 %v640_v45, %v640_v45  ;;  %v332_v24 = vsel %vm143_vm1, %v331_v37, %v2377_v35  ;;  %v350_v26 = vperm.slane %v344_v62, %v2226_v50 }
 0x150   :  { %v359_v55 = vrot.slane %v354_v21, 4  ;;  %v338_v23 = vperm.slane %v332_v24, %v2226_v50  ;;  %v362_v53 = vsel %vm143_vm1, %v354_v21, %v361_v27  ;;  %v2515_v46 = vadd.f32 %v1920_v17, %v682_v25 }
 0x151   :  { %v1024_v15 = vsel %vm943_vm2, %v939_v56, 0  ;;  %v1043_v18 = vsel %vm943_vm2, %v940_v22, 0  ;;  %v355_v28 = vrot.slane %v350_v26, 4  ;;  %v934_v39 = vpack.c.bf16 %v362_v53, %v362_v53 }
 0x152   :  { %1033 = vmatpush.bf16.xpose.msrb.mxu3 %v1024_v15  ;;  %1052 = vmatpush.bf16.xpose.msra.mxu0 %v1043_v18  ;;  %v360_v2 = vsel %vm143_vm1, %v359_v55, %v342_v19  ;;  %v357_v35 = vrot.slane %v338_v23, 4  ;;  %v2517_v37 = vadd.f32 %v1920_v17, %v684_v3 }
 0x153   :  { %v933_v1 = vpack.c.bf16 %v360_v2, %v360_v2  ;;  %v356_v63 = vsel %vm143_vm1, %v355_v28, %v338_v23 }
 0x154   :  { %v358_v10 = vsel %vm143_vm1, %v350_v26, %v357_v35  ;;  %v931_v29 = vpack.c.bf16 %v356_v63, %v356_v63  ;;  %v1893_v54 = vpack.i.bf16 %v2517_v37, %v2515_v46 }
 0x155   :  { %v932_v32 = vpack.c.bf16 %v358_v10, %v358_v10 }
 0x158   :  { %1840 = vmatmul.msk.bf16.vlgmr.msra.gmra.mxu1 %vm943_vm2, %v933_v1 }
 0x15a   :  { %1841 = vmatmul.msk.bf16.vlgmr.msra.gmra.mxu2 %vm943_vm2, %v934_v39 }
 0x15d   :  { %1839 = vmatmul.msk.bf16.vlgmr.msra.gmra.mxu0 %vm943_vm2, %v932_v32 }
 0x15e   :  { %1838 = vmatmul.msk.bf16.vlgmr.msrb.gmra.mxu3 %vm943_vm2, %v931_v29 }
 0x1c5   :  { %v997_v8 = vpop.f32.mrf.mxu1 }
 0x1c6   :  { %v1100_v59 = vmin.f32 %v997_v8, %v1096_v30 }
 0x1c8   :  { %v1112_v31 = vsel %vm943_vm2, %v1100_v59, -inf }
 0x1c9   :  { %1113 = vmax.xlane.f32.xlu1 %v1112_v31 }
 0x1ca   :  { %v978_v34 = vpop.f32.mrf.mxu0 }
 0x1cb   :  { %v2496_v58 = vmin.f32 %v978_v34, %v1096_v30 }
 0x1cd   :  { %v999_v16 = vpop.f32.mrf.mxu1  ;;  %v1016_v36 = vpop.f32.mrf.mxu2  ;;  %v1109_v38 = vsel %vm943_vm2, %v2496_v58, -inf }
 0x1ce   :  { %v1101_v44 = vmin.f32 %v1016_v36, %v1096_v30  ;;  %1110 = vmax.xlane.f32.xlu2 %v1109_v38 }
 0x1d0   :  { %v1115_v57 = vsel %vm943_vm2, %v1101_v44, -inf }
 0x1d1   :  { %v959_v40 = vpop.f32.mrf.mxu3  ;;  %1116 = vmax.xlane.f32.xlu0 %v1115_v57 }
 0x1d2   :  { %v1098_v42 = vmin.f32 %v959_v40, %v1096_v30  ;;  %v980_v51 = vpop.f32.mrf.mxu0 }
 0x1d4   :  { %v1106_v61 = vsel %vm943_vm2, %v1098_v42, -inf }
 0x1d5   :  { %v1018_v47 = vpop.f32.mrf.mxu2  ;;  %v1073_v49 = vpop.f32.mrf.mxu1 }
 0x1d6   :  { %v1104_v20 = vmin.f32 %v1073_v49, %v1097_v43  ;;  %1107 = vmax.xlane.f32.xlu2 %v1106_v61  ;;  %v765_v47 = vrot.slane %v2517_v37, 4 }
 0x1d8   :  { %v1124_v0 = vsel %vm943_vm2, %v1104_v20, -inf }
 0x1d9   :  { %v961_v41 = vpop.f32.mrf.mxu3  ;;  %1125 = vmax.xlane.f32.xlu1 %v1124_v0 }
 0x1da   :  { %v1054_v4 = vpop.f32.mrf.mxu0 }
 0x1db   :  { %v2506_v11 = vmin.f32 %v1054_v4, %v1097_v43 }
 0x1dd   :  { %v1075_v60 = vpop.f32.mrf.mxu1  ;;  %v1092_v5 = vpop.f32.mrf.mxu2  ;;  %v1121_v9 = vsel %vm943_vm2, %v2506_v11, -inf }
 0x1de   :  { %v1105_v6 = vmin.f32 %v1092_v5, %v1097_v43  ;;  %1122 = vmax.xlane.f32.xlu2 %v1121_v9 }
 0x1e0   :  { %v1127_v7 = vsel %vm943_vm2, %v1105_v6, -inf }
 0x1e1   :  { %v1035_v52 = vpop.f32.mrf.mxu3  ;;  %1128 = vmax.xlane.f32.xlu0 %v1127_v7 }
 0x1e2   :  { %v1102_v12 = vmin.f32 %v1035_v52, %v1097_v43  ;;  %v1056_v13 = vpop.f32.mrf.mxu0 }
 0x1e4   :  { %v1118_v14 = vsel %vm943_vm2, %v1102_v12, -inf }
 0x1e5   :  { %v1094_v48 = vpop.f32.mrf.mxu2 }
 0x1e6   :  { %1119 = vmax.xlane.f32.xlu2 %v1118_v14 }
 0x1e9   :  { %v1037_v19 = vpop.f32.mrf.mxu3 }
 0x1f2   :  { %1894 = vrot.lane.b32.xlu1 %v1893_v54, %s2091_s16 }
 0x1f5   :  { %1889 = vrot.lane.b32.xlu0 %v1893_v54, %s2090_s15 }
 0x1fe   :  { %1899 = vrot.lane.b32.xlu2 %v1893_v54, %s2089_s1 }
 0x23c   :  { %v1114_v45 = vpop.xlane.xlu1 %1113 }
 0x23d   :  { %v1132_v21 = vsub.f32 %v1100_v59, %v1114_v45 }
 0x23f   :  { %v1142_v56 = vmul.f32 1.442695, %v1132_v21 }
 0x241   :  { %1922 = vpow2.f32 %v1142_v56  ;;  %v1111_v22 = vpop.xlane.xlu2 %1110 }
 0x242   :  { %v1131_v27 = vsub.f32 %v2496_v58, %v1111_v22 }
 0x244   :  { %v1117_v24 = vpop.xlane.xlu0 %1116  ;;  %v1140_v39 = vmul.f32 1.442695, %v1131_v27 }
 0x245   :  { %v1133_v62 = vsub.f32 %v1101_v44, %v1117_v24 }
 0x247   :  { %v2524_v55 = vpop.eup %1922  ;;  %v1144_v23 = vmul.f32 1.442695, %v1133_v62 }
 0x248   :  { %v1160_v15 = vsel %vm943_vm2, %v2524_v55, 0.0 }
 0x249   :  { %1924 = vpow2.f32 %v1144_v23  ;;  %v1108_v18 = vpop.xlane.xlu2 %1107  ;;  %1161 = vadd.xlane.f32.xlu2 %v1160_v15 }
 0x24a   :  { %v1130_v26 = vsub.f32 %v1098_v42, %v1108_v18  ;;  %v709_v42 = vrot.slane %v2515_v46, 4 }
 0x24c   :  { %v1138_v2 = vmul.f32 1.442695, %v1130_v26  ;;  %v1126_v35 = vpop.xlane.xlu1 %1125 }
 0x24d   :  { %v1136_v28 = vsub.f32 %v1104_v20, %v1126_v35 }
 0x24e   :  { %1926 = vpow2.f32 %v1138_v2 }
 0x24f   :  { %v2529_v53 = vpop.eup %1924  ;;  %v1150_v1 = vmul.f32 1.442695, %v1136_v28 }
 0x250   :  { %v1163_v10 = vsel %vm943_vm2, %v2529_v53, 0.0 }
 0x251   :  { %1928 = vpow2.f32 %v1150_v1  ;;  %v1123_v63 = vpop.xlane.xlu2 %1122  ;;  %1164 = vadd.xlane.f32.xlu1 %v1163_v10 }
 0x252   :  { %1930 = vpow2.f32 %v1140_v39  ;;  %v1135_v16 = vsub.f32 %v2506_v11, %v1123_v63 }
 0x254   :  { %v2533_v32 = vpop.eup %1926  ;;  %v1129_v29 = vpop.xlane.xlu0 %1128  ;;  %v1148_v44 = vmul.f32 1.442695, %v1135_v16 }
 0x255   :  { %v1137_v25 = vsub.f32 %v1105_v6, %v1129_v29  ;;  %v1154_v30 = vsel %vm943_vm2, %v2533_v32, 0.0 }
 0x256   :  { %1155 = vadd.xlane.f32.xlu0 %v1154_v30 }
 0x257   :  { %v2537_v3 = vpop.eup %1928  ;;  %v1152_v8 = vmul.f32 1.442695, %v1137_v25 }
 0x258   :  { %v1172_v59 = vsel %vm943_vm2, %v2537_v3, 0.0  ;;  %v2541_v34 = vpop.eup %1930 }
 0x259   :  { %v1120_v31 = vpop.xlane.xlu2 %1119  ;;  %1173 = vadd.xlane.f32.xlu2 %v1172_v59  ;;  %1932 = vpow2.f32 %v1152_v8  ;;  %v1157_v38 = vsel %vm943_vm2, %v2541_v34, 0.0 }
 0x25a   :  { %v1134_v58 = vsub.f32 %v1102_v12, %v1120_v31 }
 0x25c   :  { %v1146_v36 = vmul.f32 1.442695, %v1134_v58 }
 0x25e   :  { %1934 = vpow2.f32 %v1146_v36  ;;  %1158 = vadd.xlane.f32.xlu0 %v1157_v38 }
 0x25f   :  { %v2546_v57 = vpop.eup %1932  ;;  %1936 = vpow2.f32 %v1148_v44 }
 0x260   :  { %v1175_v61 = vsel %vm943_vm2, %v2546_v57, 0.0 }
 0x261   :  { %v1900_v40 = vpop.permute.xlu2 %1899 }
 0x262   :  { %v1902_v43 = vunpack.i.h.bf16 %v1900_v40  ;;  %v1901_v20 = vunpack.i.l.bf16 %v1900_v40 }
 0x264   :  { %v2549_v51 = vpop.eup %1934  ;;  %v1895_v49 = vpop.permute.xlu1 %1894  ;;  %v775_v7 = vrot.slane %v1902_v43, 4  ;;  %v719_v13 = vrot.slane %v1901_v20, 4 }
 0x265   :  { %v1897_v0 = vunpack.i.h.bf16 %v1895_v49  ;;  %v1896_v41 = vunpack.i.l.bf16 %v1895_v49  ;;  %v1166_v4 = vsel %vm943_vm2, %v2549_v51, 0.0  ;;  %v2563_v19 = vpop.eup %1936 }
 0x266   :  { %1176 = vadd.xlane.f32.xlu0 %v1175_v61  ;;  %1167 = vadd.xlane.f32.xlu1 %v1166_v4  ;;  %v1169_v2 = vsel %vm943_vm2, %v2563_v19, 0.0 }
 0x267   :  { %v763_v11 = vrot.slane %v1897_v0, 4  ;;  %v766_v60 = vsel %vm143_vm1, %v1897_v0, %v765_v47  ;;  %v707_v5 = vrot.slane %v1896_v41, 4  ;;  %v710_v9 = vsel %vm143_vm1, %v1896_v41, %v709_v42  ;;  %v1890_v6 = vpop.permute.xlu0 %1889 }
 0x268   :  { %v1892_v52 = vunpack.i.h.bf16 %v1890_v6  ;;  %v1891_v12 = vunpack.i.l.bf16 %v1890_v6  ;;  %v718_v17 = vperm.slane %v710_v9, %v2214_v33  ;;  %v774_v45 = vperm.slane %v766_v60, %v2214_v33 }
 0x269   :  { %v764_v48 = vsel %vm143_vm1, %v763_v11, %v2517_v37  ;;  %v708_v14 = vsel %vm143_vm1, %v707_v5, %v2515_v46 }
 0x26a   :  { %v770_v54 = vperm.slane %v764_v48, %v2214_v33  ;;  %v714_v21 = vperm.slane %v708_v14, %v2214_v33  ;;  %v777_v56 = vrot.slane %v1892_v52, 4  ;;  %v720_v22 = vsel %vm143_vm1, %v719_v13, %v1891_v12 }
 0x26b   :  { %v721_v24 = vrot.slane %v1891_v12, 4  ;;  %v776_v62 = vsel %vm143_vm1, %v775_v7, %v1892_v52  ;;  %v726_v46 = vperm.slane %v720_v22, %v2214_v33  ;;  %v745_v18 = vrot.slane %v718_v17, 4 }
 0x26c   :  { %v789_v37 = vrot.slane %v770_v54, 4  ;;  %v733_v23 = vrot.slane %v714_v21, 4  ;;  %v782_v15 = vperm.slane %v776_v62, %v2214_v33  ;;  %v778_v27 = vsel %vm143_vm1, %v1902_v43, %v777_v56 }
 0x26d   :  { %v722_v26 = vsel %vm143_vm1, %v1901_v20, %v721_v24  ;;  %v731_v28 = vrot.slane %v726_v46, 4  ;;  %v786_v39 = vperm.slane %v778_v27, %v2214_v33  ;;  %v801_v10 = vrot.slane %v774_v45, 4 }
 0x26e   :  { %v730_v35 = vperm.slane %v722_v26, %v2214_v33  ;;  %v734_v1 = vsel %vm143_vm1, %v726_v46, %v733_v23  ;;  %1170 = vadd.xlane.f32.xlu1 %v1169_v2  ;;  %v787_v29 = vrot.slane %v782_v15, 4  ;;  %v790_v25 = vsel %vm143_vm1, %v782_v15, %v789_v37 }
 0x26f   :  { %v742_v63 = vperm.slane %v734_v1, %v2226_v50  ;;  %v732_v30 = vsel %vm143_vm1, %v731_v28, %v714_v21  ;;  %v798_v31 = vperm.slane %v790_v25, %v2226_v50  ;;  %v799_v42 = vrot.slane %v786_v39, 4 }
 0x270   :  { %v743_v8 = vrot.slane %v730_v35, 4  ;;  %v746_v59 = vsel %vm143_vm1, %v730_v35, %v745_v18  ;;  %v738_v58 = vperm.slane %v732_v30, %v2226_v50  ;;  %v788_v38 = vsel %vm143_vm1, %v787_v29, %v770_v54 }
 0x271   :  { %v754_v16 = vperm.slane %v746_v59, %v2226_v50  ;;  %v757_v36 = vrot.slane %v742_v63, 4  ;;  %v794_v40 = vperm.slane %v788_v38, %v2226_v50  ;;  %v802_v43 = vsel %vm143_vm1, %v786_v39, %v801_v10 }
 0x272   :  { %v744_v44 = vsel %vm143_vm1, %v743_v8, %v718_v17  ;;  %v755_v49 = vrot.slane %v738_v58, 4  ;;  %v800_v0 = vsel %vm143_vm1, %v799_v42, %v774_v45  ;;  %v810_v41 = vperm.slane %v802_v43, %v2226_v50 }
 0x273   :  { %v750_v47 = vperm.slane %v744_v44, %v2226_v50  ;;  %v758_v61 = vsel %vm143_vm1, 0.0, %v757_v36  ;;  %v761_v20 = vrot.slane %v754_v16, 4  ;;  %v811_v4 = vrot.slane %v794_v40, 4 }
 0x274   :  { %v813_v11 = vrot.slane %v798_v31, 4  ;;  %v756_v60 = vsel %vm143_vm1, 0.0, %v755_v49  ;;  %v806_v6 = vperm.slane %v800_v0, %v2226_v50  ;;  %v817_v12 = vrot.slane %v810_v41, 4 }
 0x275   :  { %v759_v5 = vrot.slane %v750_v47, 4  ;;  %v762_v9 = vsel %vm143_vm1, 0.0, %v761_v20  ;;  %v812_v7 = vsel %vm143_vm1, 0.0, %v811_v4  ;;  %v819_v13 = vsel %vm143_vm1, %v757_v36, %v738_v58 }
 0x276   :  { %v814_v52 = vsel %vm143_vm1, 0.0, %v813_v11  ;;  %v815_v48 = vrot.slane %v806_v6, 4  ;;  %v823_v14 = vperm.slane %v819_v13, %v2214_v33  ;;  %v824_v17 = vrot.slane %v758_v61, 4 }
 0x277   :  { %v835_v54 = vrot.slane %v762_v9, 4  ;;  %v818_v45 = vsel %vm143_vm1, 0.0, %v817_v12  ;;  %v873_v21 = vsel %vm143_vm1, %v813_v11, %v794_v40  ;;  %v878_v56 = vrot.slane %v814_v52, 4 }
 0x278   :  { %v760_v22 = vsel %vm143_vm1, 0.0, %v759_v5  ;;  %v877_v24 = vperm.slane %v873_v21, %v2214_v33  ;;  %v889_v62 = vrot.slane %v818_v45, 4  ;;  %v825_v37 = vsel %vm143_vm1, %v824_v17, %v756_v60 }
 0x279   :  { %v830_v23 = vsel %vm143_vm1, %v761_v20, %v750_v47  ;;  %v829_v46 = vperm.slane %v825_v37, %v2214_v33  ;;  %v836_v18 = vsel %vm143_vm1, %v835_v54, %v760_v22  ;;  %v843_v26 = vrot.slane %v823_v14, 4 }
 0x27a   :  { %v834_v15 = vperm.slane %v830_v23, %v2214_v33  ;;  %v840_v27 = vperm.slane %v836_v18, %v2214_v33  ;;  %v816_v2 = vsel %vm143_vm1, 0.0, %v815_v48  ;;  %v879_v35 = vsel %vm143_vm1, %v878_v56, %v812_v7 }
 0x27b   :  { %v884_v28 = vsel %vm143_vm1, %v817_v12, %v806_v6  ;;  %v844_v1 = vsel %vm143_vm1, %v829_v46, %v843_v26  ;;  %v883_v10 = vperm.slane %v879_v35, %v2214_v33  ;;  %v890_v25 = vsel %vm143_vm1, %v889_v62, %v816_v2 }
 0x27c   :  { %v855_v39 = vrot.slane %v834_v15, 4  ;;  %v888_v63 = vperm.slane %v884_v28, %v2214_v33  ;;  %v852_v29 = vperm.slane %v844_v1, %v2226_v50  ;;  %v897_v30 = vrot.slane %v877_v24, 4 }
 0x27d   :  { %v841_v8 = vrot.slane %v829_v46, 4  ;;  %v894_v31 = vperm.slane %v890_v25, %v2214_v33  ;;  %v853_v16 = vrot.slane %v840_v27, 4  ;;  %v895_v5 = vrot.slane %v883_v10, 4 }
 0x27e   :  { %v856_v59 = vsel %vm143_vm1, %v840_v27, %v855_v39  ;;  %v909_v58 = vrot.slane %v888_v63, 4  ;;  %v871_v38 = vrot.slane %v852_v29, 4  ;;  %v898_v44 = vsel %vm143_vm1, %v883_v10, %v897_v30 }
 0x27f   :  { %v864_v36 = vperm.slane %v856_v59, %v2226_v50  ;;  %v842_v40 = vsel %vm143_vm1, %v841_v8, %v823_v14  ;;  %v906_v42 = vperm.slane %v898_v44, %v2226_v50  ;;  %v854_v49 = vsel %vm143_vm1, %v853_v16, %v834_v15 }
 0x280   :  { %v910_v43 = vsel %vm143_vm1, %v894_v31, %v909_v58  ;;  %v848_v47 = vperm.slane %v842_v40, %v2226_v50  ;;  %v860_v41 = vperm.slane %v854_v49, %v2226_v50  ;;  %v907_v52 = vrot.slane %v894_v31, 4 }
 0x281   :  { %v872_v61 = vsel %vm143_vm1, %v864_v36, %v871_v38  ;;  %v869_v20 = vrot.slane %v864_v36, 4  ;;  %v918_v0 = vperm.slane %v910_v43, %v2226_v50  ;;  %v925_v11 = vrot.slane %v906_v42, 4 }
 0x282   :  { %v1317_v4 = vpack.c.bf16 %v872_v61, %v872_v61  ;;  %v867_v60 = vrot.slane %v848_v47, 4  ;;  %v865_v7 = vrot.slane %v860_v41, 4  ;;  %v896_v37 = vsel %vm143_vm1, %v895_v5, %v877_v24 }
 0x283   :  { %v870_v9 = vsel %vm143_vm1, %v869_v20, %v852_v29  ;;  %v923_v6 = vrot.slane %v918_v0, 4  ;;  %v926_v48 = vsel %vm143_vm1, %v918_v0, %v925_v11  ;;  %v902_v15 = vperm.slane %v896_v37, %v2226_v50 }
 0x284   :  { %v1384_v12 = vsel %vm1325_vm3, %v1317_v4, 0  ;;  %v1316_v13 = vpack.c.bf16 %v870_v9, %v870_v9  ;;  %v868_v14 = vsel %vm143_vm1, %v860_v41, %v867_v60  ;;  %v1321_v17 = vpack.c.bf16 %v926_v48, %v926_v48 }
 0x285   :  { %1393 = vmatpush.bf16.msrb.mxu2 %v1384_v12  ;;  %v1315_v54 = vpack.c.bf16 %v868_v14, %v868_v14  ;;  %v924_v45 = vsel %vm143_vm1, %v923_v6, %v906_v42  ;;  %v866_v21 = vsel %vm143_vm1, %v865_v7, %v848_v47  ;;  %v908_v18 = vsel %vm143_vm1, %v907_v52, %v888_v63 }
 0x286   :  { %v1365_v56 = vsel %vm1325_vm3, %v1316_v13, 0  ;;  %v1320_v22 = vpack.c.bf16 %v924_v45, %v924_v45  ;;  %v1314_v62 = vpack.c.bf16 %v866_v21, %v866_v21  ;;  %v1460_v23 = vsel %vm1325_vm3, %v1321_v17, 0 }
 0x287   :  { %1374 = vmatpush.bf16.msrb.mxu1 %v1365_v56  ;;  %v1346_v46 = vsel %vm1325_vm3, %v1315_v54, 0  ;;  %v914_v2 = vperm.slane %v908_v18, %v2226_v50  ;;  %v921_v24 = vrot.slane %v902_v15, 4 }
 0x288   :  { %1355 = vmatpush.bf16.msrb.mxu0 %v1346_v46  ;;  %v1441_v26 = vsel %vm1325_vm3, %v1320_v22, 0  ;;  %v1327_v27 = vsel %vm1325_vm3, %v1314_v62, 0 }
 0x289   :  { %1469 = vmatpush.bf16.msra.mxu2 %v1460_v23  ;;  %1336 = vmatpush.bf16.msra.mxu3 %v1327_v27  ;;  %v919_v35 = vrot.slane %v914_v2, 4  ;;  %v922_v28 = vsel %vm143_vm1, %v914_v2, %v921_v24 }
 0x28a   :  { %v1319_v1 = vpack.c.bf16 %v922_v28, %v922_v28 }
 0x28b   :  { %1450 = vmatpush.bf16.msra.mxu1 %v1441_v26  ;;  %v920_v39 = vsel %vm143_vm1, %v919_v35, %v902_v15 }
 0x28c   :  { %v1318_v10 = vpack.c.bf16 %v920_v39, %v920_v39  ;;  %v1422_v63 = vsel %vm1325_vm3, %v1319_v1, 0 }
 0x28d   :  { %1431 = vmatpush.bf16.msra.mxu0 %v1422_v63 }
 0x28e   :  { %v1403_v29 = vsel %vm1325_vm3, %v1318_v10, 0 }
 0x28f   :  { %1412 = vmatpush.bf16.msrb.mxu3 %v1403_v29 }
 0x2bc   :  { %v1162_v25 = vpop.xlane.xlu2 %1161 }
 0x2bd   :  { %1938 = vrcp.f32 %v1162_v25  ;;  %v1219_v58 = vand.u32 2147483648, %v1162_v25  ;;  %v1217_v36 = vand.u32 2147483647, %v1162_v25  ;;  %vm1213_vm5 = vweird.f32 %v1162_v25 }
 0x2bf   :  { %v1220_v42 = vor.u32 1.1754944e-38, %v1219_v58  ;;  %vm1218_vm7 = vcmp.eq.f32.partialorder %v1217_v36, 8.507059e+37 }
 0x2c3   :  { %v1939_v30 = vpop.eup %1938 }
 0x2c4   :  { %v1209_v8 = vmul.f32 %v1939_v30, %v1162_v25  ;;  %v1165_v59 = vpop.xlane.xlu1 %1164  ;;  %vm1214_vm4 = vweird.f32 %v1939_v30 }
 0x2c5   :  { %1940 = vrcp.f32 %v1165_v59  ;;  %vm1215_vm6 = vmor %vm1213_vm5, %vm1214_vm4  ;;  %v1234_v41 = vand.u32 2147483648, %v1165_v59  ;;  %v1232_v60 = vand.u32 2147483647, %v1165_v59  ;;  %vm1228_vm9 = vweird.f32 %v1165_v59 }
 0x2c6   :  { %v1210_v31 = vsub.f32 1.0, %v1209_v8 }
 0x2c7   :  { %vm1233_vm11 = vcmp.eq.f32.partialorder %v1232_v60, 8.507059e+37 }
 0x2c8   :  { %v1211_v16 = vmul.f32 %v1939_v30, %v1210_v31 }
 0x2c9   :  { %v1156_v38 = vpop.xlane.xlu0 %1155 }
 0x2ca   :  { %v1212_v44 = vadd.f32 %v1939_v30, %v1211_v16  ;;  %1942 = vrcp.f32 %v1156_v38  ;;  %v1189_v13 = vand.u32 2147483648, %v1156_v38  ;;  %v1187_v45 = vand.u32 2147483647, %v1156_v38 }
 0x2cb   :  { %v1941_v40 = vpop.eup %1940  ;;  %vm1183_vm13 = vweird.f32 %v1156_v38 }
 0x2cc   :  { %v1216_v43 = vsel %vm1215_vm6, %v1939_v30, %v1212_v44  ;;  %v1224_v47 = vmul.f32 %v1941_v40, %v1165_v59  ;;  %v1174_v49 = vpop.xlane.xlu2 %1173  ;;  %vm1229_vm8 = vweird.f32 %v1941_v40  ;;  %v1190_v62 = vor.u32 1.1754944e-38, %v1189_v13 }
 0x2cd   :  { %v1221_v61 = vsel %vm1218_vm7, %v1220_v42, %v1216_v43  ;;  %1944 = vrcp.f32 %v1174_v49  ;;  %vm1230_vm10 = vmor %vm1228_vm9, %vm1229_vm8  ;;  %v1279_v37 = vand.u32 2147483648, %v1174_v49  ;;  %v1277_v15 = vand.u32 2147483647, %v1174_v49 }
 0x2ce   :  { %v1222_v20 = vmul.f32 %v2524_v55, %v1221_v61  ;;  %v1225_v0 = vsub.f32 1.0, %v1224_v47  ;;  %v1235_v55 = vor.u32 1.1754944e-38, %v1234_v41  ;;  %vm1188_vm3 = vcmp.eq.f32.partialorder %v1187_v45, 8.507059e+37 }
 0x2cf   :  { %vm1273_vm4 = vweird.f32 %v1174_v49  ;;  %v1280_v1 = vor.u32 1.1754944e-38, %v1279_v37  ;;  %vm1278_vm6 = vcmp.eq.f32.partialorder %v1277_v15, 8.507059e+37 }
 0x2d0   :  { %v1943_v4 = vpop.eup %1942  ;;  %1300 = vst.msk [vmem:[#allocation9 + $0x10] sm:$0xff] %vm943_vm2, %v1222_v20  ;;  %v1226_v11 = vmul.f32 %v1941_v40, %v1225_v0  ;;  %v1308_v5 = vpack.c.bf16 %v1222_v20, %v1222_v20 }
 0x2d1   :  { %v1179_v9 = vmul.f32 %v1943_v4, %v1156_v38  ;;  %v2652_v6 = vpop.xlane.xlu0 %1158  ;;  %vm1184_vm12 = vweird.f32 %v1943_v4 }
 0x2d2   :  { %v1227_v7 = vadd.f32 %v1941_v40, %v1226_v11  ;;  %1946 = vrcp.f32 %v2652_v6  ;;  %1844 = vmatmul.msk.bf16.vlgmr.msrb.gmra.mxu1 %vm943_vm2, %v1308_v5  ;;  %vm1185_vm14 = vmor %vm1183_vm13, %vm1184_vm12  ;;  %v1204_v63 = vand.u32 2147483648, %v2652_v6  ;;  %v1202_v30 = vand.u32 2147483647, %v2652_v6 }
 0x2d3   :  { %v1945_v52 = vpop.eup %1944  ;;  %v1180_v12 = vsub.f32 1.0, %v1179_v9  ;;  %vm1198_vm8 = vweird.f32 %v2652_v6 }
 0x2d4   :  { %v1231_v48 = vsel %vm1230_vm10, %v1941_v40, %v1227_v7  ;;  %v1269_v14 = vmul.f32 %v1945_v52, %v1174_v49  ;;  %vm1274_vm15 = vweird.f32 %v1945_v52  ;;  %v1205_v58 = vor.u32 1.1754944e-38, %v1204_v63 }
 0x2d5   :  { %v1236_v17 = vsel %vm1233_vm11, %v1235_v55, %v1231_v48  ;;  %v1181_v54 = vmul.f32 %v1943_v4, %v1180_v12  ;;  %vm1275_vm5 = vmor %vm1273_vm4, %vm1274_vm15  ;;  %vm1203_vm10 = vcmp.eq.f32.partialorder %v1202_v30, 8.507059e+37 }
 0x2d6   :  { %v1237_v21 = vmul.f32 %v2529_v53, %v1236_v17  ;;  %v1270_v56 = vsub.f32 1.0, %v1269_v14 }
 0x2d7   :  { %v1182_v22 = vadd.f32 %v1943_v4, %v1181_v54 }
 0x2d8   :  { %v1947_v23 = vpop.eup %1946  ;;  %1301 = vst.msk [vmem:[#allocation9 + $0x18] sm:$0xff] %vm943_vm2, %v1237_v21  ;;  %v1271_v46 = vmul.f32 %v1945_v52, %v1270_v56  ;;  %v1309_v18 = vpack.c.bf16 %v1237_v21, %v1237_v21 }
 0x2d9   :  { %v1186_v26 = vsel %vm1185_vm14, %v1943_v4, %v1182_v22  ;;  %v1194_v27 = vmul.f32 %v1947_v23, %v2652_v6  ;;  %v1177_v2 = vpop.xlane.xlu0 %1176  ;;  %v2659_v24 = vpop.xlane.xlu1 %1167  ;;  %vm1199_vm7 = vweird.f32 %v1947_v23 }
 0x2da   :  { %v1191_v53 = vsel %vm1188_vm3, %v1190_v62, %v1186_v26  ;;  %v1272_v35 = vadd.f32 %v1945_v52, %v1271_v46  ;;  %1948 = vrcp.f32 %v1177_v2  ;;  %1845 = vmatmul.msk.bf16.vlgmr.msrb.gmra.mxu2 %vm943_vm2, %v1309_v18  ;;  %vm1200_vm9 = vmor %vm1198_vm8, %vm1199_vm7  ;;  %v1292_v49 = vand.u32 2147483647, %v1177_v2 }
 0x2db   :  { %v1192_v28 = vmul.f32 %v2533_v32, %v1191_v53  ;;  %v1195_v39 = vsub.f32 1.0, %v1194_v27  ;;  %1950 = vrcp.f32 %v2659_v24  ;;  %v1294_v61 = vand.u32 2147483648, %v1177_v2 }
 0x2dc   :  { %v1276_v10 = vsel %vm1275_vm5, %v1945_v52, %v1272_v35  ;;  %vm1288_vm12 = vweird.f32 %v1177_v2  ;;  %v1249_v4 = vand.u32 2147483648, %v2659_v24  ;;  %v1247_v5 = vand.u32 2147483647, %v2659_v24 }
 0x2dd   :  { %1298 = vst.msk [vmem:[#allocation9] sm:$0xff] %vm943_vm2, %v1192_v28  ;;  %v1281_v29 = vsel %vm1278_vm6, %v1280_v1, %v1276_v10  ;;  %v1196_v25 = vmul.f32 %v1947_v23, %v1195_v39  ;;  %v1306_v59 = vpack.c.bf16 %v1192_v28, %v1192_v28  ;;  %v1295_v9 = vor.u32 1.1754944e-38, %v1294_v61 }
 0x2de   :  { %v1282_v8 = vmul.f32 %v2537_v3, %v1281_v29  ;;  %vm1243_vm15 = vweird.f32 %v2659_v24  ;;  %vm1293_vm3 = vcmp.eq.f32.partialorder %v1292_v49, 8.507059e+37  ;;  %v1250_v12 = vor.u32 1.1754944e-38, %v1249_v4 }
 0x2df   :  { %v1197_v32 = vadd.f32 %v1947_v23, %v1196_v25  ;;  %1842 = vmatmul.msk.bf16.vlgmr.msra.gmra.mxu3 %vm943_vm2, %v1306_v59  ;;  %vm1248_vm5 = vcmp.eq.f32.partialorder %v1247_v5, 8.507059e+37 }
 0x2e0   :  { %v1949_v31 = vpop.eup %1948  ;;  %1304 = vst.msk [vmem:[#allocation9 + $0x30] sm:$0xff] %vm943_vm2, %v1282_v8  ;;  %v1312_v16 = vpack.c.bf16 %v1282_v8, %v1282_v8 }
 0x2e1   :  { %v1201_v36 = vsel %vm1200_vm9, %v1947_v23, %v1197_v32  ;;  %v1284_v38 = vmul.f32 %v1949_v31, %v1177_v2  ;;  %v1171_v44 = vpop.xlane.xlu1 %1170  ;;  %v1951_v40 = vpop.eup %1950  ;;  %vm1289_vm11 = vweird.f32 %v1949_v31 }
 0x2e2   :  { %v1206_v42 = vsel %vm1203_vm10, %v1205_v58, %v1201_v36  ;;  %1952 = vrcp.f32 %v1171_v44  ;;  %1848 = vmatmul.msk.bf16.vlgmr.msra.gmra.mxu1 %vm943_vm2, %v1312_v16  ;;  %v1239_v47 = vmul.f32 %v1951_v40, %v2659_v24  ;;  %vm1244_vm13 = vweird.f32 %v1951_v40  ;;  %vm1290_vm14 = vmor %vm1288_vm12, %vm1289_vm11 }
 0x2e3   :  { %v1207_v3 = vmul.f32 %v2541_v34, %v1206_v42  ;;  %v1285_v43 = vsub.f32 1.0, %v1284_v38  ;;  %vm1245_vm4 = vmor %vm1243_vm15, %vm1244_vm13  ;;  %v1262_v54 = vand.u32 2147483647, %v1171_v44  ;;  %v1264_v45 = vand.u32 2147483648, %v1171_v44 }
 0x2e4   :  { %v1240_v0 = vsub.f32 1.0, %v1239_v47  ;;  %vm1258_vm7 = vweird.f32 %v1171_v44  ;;  %vm1721_vm10 = vcmask 130048   ;;  %vm1724_vm11 = vcmask 195584  }
 0x2e5   :  { %1299 = vst.msk [vmem:[#allocation9 + $0x8] sm:$0xff] %vm943_vm2, %v1207_v3  ;;  %v1286_v20 = vmul.f32 %v1949_v31, %v1285_v43  ;;  %v1307_v41 = vpack.c.bf16 %v1207_v3, %v1207_v3  ;;  %vm1263_vm9 = vcmp.eq.f32.partialorder %v1262_v54, 8.507059e+37 }
 0x2e6   :  { %v1241_v60 = vmul.f32 %v1951_v40, %v1240_v0 }
 0x2e7   :  { %v1287_v11 = vadd.f32 %v1949_v31, %v1286_v20  ;;  %1843 = vmatmul.msk.bf16.vlgmr.msrb.gmra.mxu0 %vm943_vm2, %v1307_v41 }
 0x2e8   :  { %v1953_v34 = vpop.eup %1952  ;;  %v1242_v7 = vadd.f32 %v1951_v40, %v1241_v60 }
 0x2e9   :  { %v1291_v6 = vsel %vm1290_vm14, %v1949_v31, %v1287_v11  ;;  %v1254_v52 = vmul.f32 %v1953_v34, %v1171_v44  ;;  %vm1259_vm6 = vweird.f32 %v1953_v34 }
 0x2ea   :  { %v1296_v55 = vsel %vm1293_vm3, %v1295_v9, %v1291_v6  ;;  %v1246_v48 = vsel %vm1245_vm4, %v1951_v40, %v1242_v7  ;;  %vm1260_vm8 = vmor %vm1258_vm7, %vm1259_vm6 }
 0x2eb   :  { %v1297_v13 = vmul.f32 %v2546_v57, %v1296_v55  ;;  %v1255_v14 = vsub.f32 1.0, %v1254_v52  ;;  %v1251_v17 = vsel %vm1248_vm5, %v1250_v12, %v1246_v48  ;;  %v1265_v57 = vor.u32 1.1754944e-38, %v1264_v45 }
 0x2ec   :  { %v1252_v21 = vmul.f32 %v2549_v51, %v1251_v17 }
 0x2ed   :  { %1305 = vst.msk [vmem:[#allocation9 + $0x38] sm:$0xff] %vm943_vm2, %v1297_v13  ;;  %v1256_v56 = vmul.f32 %v1953_v34, %v1255_v14  ;;  %v1313_v22 = vpack.c.bf16 %v1297_v13, %v1297_v13 }
 0x2ee   :  { %1302 = vst.msk [vmem:[#allocation9 + $0x20] sm:$0xff] %vm943_vm2, %v1252_v21  ;;  %v1310_v37 = vpack.c.bf16 %v1252_v21, %v1252_v21 }
 0x2ef   :  { %v1257_v62 = vadd.f32 %v1953_v34, %v1256_v56  ;;  %1849 = vmatmul.msk.bf16.vlgmr.msra.gmra.mxu2 %vm943_vm2, %v1313_v22 }
 0x2f0   :  { %1846 = vmatmul.msk.bf16.vlgmr.msrb.gmra.mxu3 %vm943_vm2, %v1310_v37 }
 0x2f1   :  { %v1261_v23 = vsel %vm1260_vm8, %v1953_v34, %v1257_v62 }
 0x2f2   :  { %v1266_v46 = vsel %vm1263_vm9, %v1265_v57, %v1261_v23 }
 0x2f3   :  { %v1267_v15 = vmul.f32 %v2563_v19, %v1266_v46 }
 0x2f5   :  { %1303 = vst.msk [vmem:[#allocation9 + $0x28] sm:$0xff] %vm943_vm2, %v1267_v15  ;;  %v1311_v51 = vpack.c.bf16 %v1267_v15, %v1267_v15 }
 0x2f6   :  { %1792 = dma.vmem_to_hbm [thread:$0]  %s1785_s25, 1024, %s1787_s27, [#allocation10], %s2086_s21, %s2086_s21, %s2087_s22  }
 0x2f7   :  { %1847 = vmatmul.msk.bf16.vlgmr.msra.gmra.mxu0 %vm943_vm2, %v1311_v51 }
 0x34f   :  { %v1376_v18 = vpop.f32.mrf.mxu1 }
 0x350   :  { %v1475_v24 = vrot.slane %v1376_v18, 4 }
 0x357   :  { %v1378_v26 = vpop.f32.mrf.mxu1 }
 0x35d   :  { %v1395_v27 = vpop.f32.mrf.mxu2 }
 0x35e   :  { %v1487_v53 = vrot.slane %v1395_v27, 4 }
 0x35f   :  { %v1452_v2 = vpop.f32.mrf.mxu1 }
 0x360   :  { %v1531_v48 = vrot.slane %v1452_v2, 4 }
 0x362   :  { %v1338_v35 = vpop.f32.mrf.mxu3 }
 0x363   :  { %v1476_v28 = vsel %vm143_vm1, %v1475_v24, %v1338_v35  ;;  %v1477_v1 = vrot.slane %v1338_v35, 4 }
 0x364   :  { %v1357_v39 = vpop.f32.mrf.mxu0  ;;  %v1482_v10 = vperm.slane %v1476_v28, %v2214_v33 }
 0x365   :  { %v1488_v19 = vsel %vm143_vm1, %v1487_v53, %v1357_v39  ;;  %v1489_v63 = vrot.slane %v1357_v39, 4  ;;  %v1397_v29 = vpop.f32.mrf.mxu2  ;;  %v1478_v25 = vsel %vm143_vm1, %v1376_v18, %v1477_v1 }
 0x366   :  { %v1494_v30 = vperm.slane %v1488_v19, %v2214_v33  ;;  %v1486_v8 = vperm.slane %v1478_v25, %v2214_v33  ;;  %v1501_v59 = vrot.slane %v1482_v10, 4 }
 0x367   :  { %v1490_v32 = vsel %vm143_vm1, %v1395_v27, %v1489_v63  ;;  %v1454_v31 = vpop.f32.mrf.mxu1 }
 0x368   :  { %v1498_v58 = vperm.slane %v1490_v32, %v2214_v33  ;;  %v1499_v16 = vrot.slane %v1494_v30, 4  ;;  %v1513_v36 = vrot.slane %v1486_v8, 4  ;;  %v1502_v38 = vsel %vm143_vm1, %v1494_v30, %v1501_v59 }
 0x369   :  { %v1510_v40 = vperm.slane %v1502_v38, %v2226_v50 }
 0x36a   :  { %v1500_v44 = vsel %vm143_vm1, %v1499_v16, %v1482_v10  ;;  %v1511_v42 = vrot.slane %v1498_v58, 4  ;;  %v1514_v43 = vsel %vm143_vm1, %v1498_v58, %v1513_v36  ;;  %v1340_v47 = vpop.f32.mrf.mxu3 }
 0x36b   :  { %v1506_v3 = vperm.slane %v1500_v44, %v2226_v50  ;;  %v1522_v61 = vperm.slane %v1514_v43, %v2226_v50  ;;  %v1525_v20 = vrot.slane %v1510_v40, 4 }
 0x36c   :  { %v1512_v49 = vsel %vm143_vm1, %v1511_v42, %v1486_v8  ;;  %v1359_v0 = vpop.f32.mrf.mxu0 }
 0x36d   :  { %v1518_v41 = vperm.slane %v1512_v49, %v2226_v50  ;;  %v1523_v4 = vrot.slane %v1506_v3, 4  ;;  %v1526_v11 = vsel %vm143_vm1, 0.0, %v1525_v20  ;;  %v1529_v60 = vrot.slane %v1522_v61, 4 }
 0x36e   :  { %v1592_v9 = vrot.slane %v1526_v11, 4  ;;  %v1587_v7 = vsel %vm143_vm1, %v1525_v20, %v1506_v3 }
 0x36f   :  { %v1524_v5 = vsel %vm143_vm1, 0.0, %v1523_v4  ;;  %v1527_v34 = vrot.slane %v1518_v41, 4  ;;  %v1530_v6 = vsel %vm143_vm1, 0.0, %v1529_v60  ;;  %v1598_v55 = vsel %vm143_vm1, %v1529_v60, %v1518_v41 }
 0x370   :  { %v1593_v52 = vsel %vm143_vm1, %v1592_v9, %v1524_v5  ;;  %v1603_v12 = vrot.slane %v1530_v6, 4  ;;  %v1591_v17 = vperm.slane %v1587_v7, %v2214_v33  ;;  %v1602_v62 = vperm.slane %v1598_v55, %v2214_v33 }
 0x371   :  { %v1528_v13 = vsel %vm143_vm1, 0.0, %v1527_v34  ;;  %v1597_v54 = vperm.slane %v1593_v52, %v2214_v33 }
 0x372   :  { %v1471_v14 = vpop.f32.mrf.mxu2  ;;  %v1604_v21 = vsel %vm143_vm1, %v1603_v12, %v1528_v13  ;;  %v1611_v26 = vrot.slane %v1591_v17, 4  ;;  %v1623_v10 = vrot.slane %v1602_v62, 4 }
 0x373   :  { %v1543_v45 = vrot.slane %v1471_v14, 4  ;;  %v1414_v56 = vpop.f32.mrf.mxu3  ;;  %v1608_v37 = vperm.slane %v1604_v21, %v2214_v33  ;;  %v1609_v53 = vrot.slane %v1597_v54, 4 }
 0x374   :  { %v1433_v22 = vpop.f32.mrf.mxu0  ;;  %v1532_v57 = vsel %vm143_vm1, %v1531_v48, %v1414_v56  ;;  %v1533_v23 = vrot.slane %v1414_v56, 4  ;;  %v1612_v32 = vsel %vm143_vm1, %v1597_v54, %v1611_v26 }
 0x375   :  { %v1544_v46 = vsel %vm143_vm1, %v1543_v45, %v1433_v22  ;;  %v1545_v15 = vrot.slane %v1433_v22, 4  ;;  %v1538_v51 = vperm.slane %v1532_v57, %v2214_v33  ;;  %v1621_v19 = vrot.slane %v1608_v37, 4 }
 0x376   :  { %v1550_v18 = vperm.slane %v1544_v46, %v2214_v33  ;;  %v1534_v27 = vsel %vm143_vm1, %v1452_v2, %v1533_v23  ;;  %v1610_v38 = vsel %vm143_vm1, %v1609_v53, %v1591_v17  ;;  %v1620_v47 = vperm.slane %v1612_v32, %v2226_v50  ;;  %v1865_v32 = vld [vmem:[#allocation7] sm:$0xff] }
 0x377   :  { %v1546_v24 = vsel %vm143_vm1, %v1471_v14, %v1545_v15  ;;  %v1542_v35 = vperm.slane %v1534_v27, %v2214_v33  ;;  %v1557_v28 = vrot.slane %v1538_v51, 4  ;;  %v1622_v44 = vsel %vm143_vm1, %v1621_v19, %v1602_v62 }
 0x378   :  { %v1554_v1 = vperm.slane %v1546_v24, %v2214_v33  ;;  %v1555_v39 = vrot.slane %v1550_v18, 4  ;;  %v1624_v49 = vsel %vm143_vm1, %v1608_v37, %v1623_v10  ;;  %v1628_v61 = vperm.slane %v1622_v44, %v2226_v50 }
 0x379   :  { %v1569_v63 = vrot.slane %v1542_v35, 4  ;;  %v1558_v25 = vsel %vm143_vm1, %v1550_v18, %v1557_v28  ;;  %v1616_v5 = vperm.slane %v1610_v38, %v2226_v50  ;;  %v1632_v54 = vperm.slane %v1624_v49, %v2226_v50 }
 0x37a   :  { %v1556_v29 = vsel %vm143_vm1, %v1555_v39, %v1538_v51  ;;  %v1567_v30 = vrot.slane %v1554_v1, 4  ;;  %v1473_v8 = vpop.f32.mrf.mxu2  ;;  %v1566_v59 = vperm.slane %v1558_v25, %v2226_v50  ;;  %v1633_v34 = vrot.slane %v1628_v61, 4 }
 0x37b   :  { %v1562_v2 = vperm.slane %v1556_v29, %v2226_v50  ;;  %v1570_v58 = vsel %vm143_vm1, %v1554_v1, %v1569_v63  ;;  %v1416_v16 = vpop.f32.mrf.mxu3  ;;  %v1639_v56 = vrot.slane %v1620_v47, 4  ;;  %v1637_v46 = vrot.slane %v1632_v54, 4 }
 0x37c   :  { %v1568_v31 = vsel %vm143_vm1, %v1567_v30, %v1542_v35  ;;  %v1435_v36 = vpop.f32.mrf.mxu0  ;;  %v1578_v42 = vperm.slane %v1570_v58, %v2226_v50  ;;  %v1581_v43 = vrot.slane %v1566_v59, 4  ;;  %v1634_v48 = vsel %vm143_vm1, %v1633_v34, %v1616_v5 }
 0x37d   :  { %v1574_v40 = vperm.slane %v1568_v31, %v2226_v50  ;;  %v1579_v3 = vrot.slane %v1562_v2, 4  ;;  %v1635_v27 = vrot.slane %v1616_v5, 4  ;;  %v1640_v53 = vsel %vm143_vm1, %v1632_v54, %v1639_v56 }
 0x37e   :  { %v1582_v0 = vsel %vm143_vm1, 0.0, %v1581_v43  ;;  %v1585_v4 = vrot.slane %v1578_v42, 4  ;;  %v1641_v11 = vsel %vm143_vm1, %v1581_v43, %v1562_v2  ;;  %v1638_v19 = vsel %vm143_vm1, %v1637_v46, %v1620_v47 }
 0x37f   :  { %v1580_v20 = vsel %vm143_vm1, 0.0, %v1579_v3  ;;  %v1583_v41 = vrot.slane %v1574_v40, 4  ;;  %v1646_v60 = vrot.slane %v1582_v0, 4  ;;  %v1645_v6 = vperm.slane %v1641_v11, %v2214_v33 }
 0x380   :  { %v1586_v9 = vsel %vm143_vm1, 0.0, %v1585_v4  ;;  %v1652_v7 = vsel %vm143_vm1, %v1585_v4, %v1574_v40  ;;  %v1636_v29 = vsel %vm143_vm1, %v1628_v61, %v1635_v27  ;;  %v1921_v4 = vld [vmem:[%s2796_s7] ss:$0 sm:$0xff] }
 0x381   :  { %v1584_v52 = vsel %vm143_vm1, 0.0, %v1583_v41  ;;  %v1647_v55 = vsel %vm143_vm1, %v1646_v60, %v1580_v20  ;;  %v1657_v12 = vrot.slane %v1586_v9, 4  ;;  %v1656_v13 = vperm.slane %v1652_v7, %v2214_v33 }
 0x382   :  { %v1651_v14 = vperm.slane %v1647_v55, %v2214_v33  ;;  %v1665_v17 = vrot.slane %v1645_v6, 4 }
 0x383   :  { %v1658_v45 = vsel %vm143_vm1, %v1657_v12, %v1584_v52  ;;  %v1677_v21 = vrot.slane %v1656_v13, 4 }
 0x384   :  { %v1662_v22 = vperm.slane %v1658_v45, %v2214_v33  ;;  %v1666_v62 = vsel %vm143_vm1, %v1651_v14, %v1665_v17  ;;  %v1663_v37 = vrot.slane %v1651_v14, 4 }
 0x385   :  { %v1674_v57 = vperm.slane %v1666_v62, %v2226_v50 }
 0x386   :  { %v1678_v23 = vsel %vm143_vm1, %v1662_v22, %v1677_v21  ;;  %v1664_v15 = vsel %vm143_vm1, %v1663_v37, %v1645_v6  ;;  %v1675_v51 = vrot.slane %v1662_v22, 4 }
 0x387   :  { %v1686_v18 = vperm.slane %v1678_v23, %v2226_v50  ;;  %v1693_v26 = vrot.slane %v1674_v57, 4  ;;  %v1670_v24 = vperm.slane %v1664_v15, %v2226_v50 }
 0x388   :  { %v1676_v33 = vsel %vm143_vm1, %v1675_v51, %v1656_v13 }
 0x389   :  { %v1694_v35 = vsel %vm143_vm1, %v1686_v18, %v1693_v26  ;;  %v1691_v28 = vrot.slane %v1686_v18, 4  ;;  %v1682_v1 = vperm.slane %v1676_v33, %v2226_v50  ;;  %v1689_v39 = vrot.slane %v1670_v24, 4  ;;  %v1866_v50 = vld [vmem:[#allocation7 + $0x8] sm:$0xff] }
 0x38a   :  { %v1913_v10 = vpack.i.bf16 %v1694_v35, %v1640_v53  ;;  %1757 = vmatpush.bf16.msra.mxu3 %v1866_v50 }
 0x38b   :  { %v1692_v63 = vsel %vm143_vm1, %v1691_v28, %v1674_v57  ;;  %v1687_v25 = vrot.slane %v1682_v1, 4  ;;  %v1690_v30 = vsel %vm143_vm1, %v1682_v1, %v1689_v39 }
 0x38c   :  { %1914 = vrot.lane.b32.xlu1 %v1913_v10, %s2094_s5  ;;  %v1908_v8 = vpack.i.bf16 %v1692_v63, %v1638_v19  ;;  %v1903_v2 = vpack.i.bf16 %v1690_v30, %v1636_v29 }
 0x38d   :  { %v1688_v59 = vsel %vm143_vm1, %v1687_v25, %v1670_v24 }
 0x38e   :  { %1909 = vrot.lane.b32.xlu2 %v1908_v8, %s2095_s23  ;;  %1904 = vrot.lane.b32.xlu0 %v1903_v2, %s2087_s22 }
 0x38f   :  { %1758 = vmatpush.bf16.msra.mxu3 %v1865_v32 }
 0x3e8   :  { %v1910_v31 = vpop.permute.xlu2 %1909 }
 0x3e9   :  { %v1912_v44 = vunpack.i.h.bf16 %v1910_v31  ;;  %v1911_v40 = vunpack.i.l.bf16 %v1910_v31 }
 0x3fe   :  { %v1915_v58 = vpop.permute.xlu1 %1914 }
 0x3ff   :  { %v1917_v42 = vunpack.i.h.bf16 %v1915_v58  ;;  %v1916_v3 = vunpack.i.l.bf16 %v1915_v58 }
 0x400   :  { %v1905_v16 = vpop.permute.xlu0 %1904 }
 0x401   :  { %v1907_v36 = vunpack.i.h.bf16 %v1905_v16  ;;  %v1906_v38 = vunpack.i.l.bf16 %v1905_v16 }
 0x403   :  { %v1719_v43 = vsel %vm943_vm2, %v1634_v48, %v1906_v38  ;;  %v1720_v47 = vsel %vm943_vm2, %v1688_v59, %v1907_v36 }
 0x404   :  { %v1722_v49 = vsel %vm1721_vm10, %v1719_v43, %v1911_v40  ;;  %v1723_v61 = vsel %vm1721_vm10, %v1720_v47, %v1912_v44 }
 0x405   :  { %v1725_v20 = vsel %vm1724_vm11, %v1722_v49, %v1916_v3  ;;  %v1726_v0 = vsel %vm1724_vm11, %v1723_v61, %v1917_v42 }
 0x406   :  { %v1727_v41 = vpack.c.bf16 %v1726_v0, %v1725_v20 }
 0x408   :  { %1858 = vmatmul.msk.bf16.vlgmr.msra.gmra.mxu3 %vm104_vm0, %v1727_v41 }
 0x48b   :  { %v1760_v11 = vpop.f32.mrf.mxu3 }
 0x48c   :  { %v1761_v60 = vadd.f32 %v1921_v4, %v1760_v11 }
 0x48e   :  { %1765 = vst.msk [vmem:[#allocation8] sm:$0xff] %vm104_vm0, %v1761_v60 }
 0x493   :  { %v1762_v5 = vpop.f32.mrf.mxu3 }
 0x494   :  { %v1763_v34 = vadd.f32 %v1921_v4, %v1762_v5 }
 0x496   :  { %1766 = vst.msk [vmem:[#allocation8 + $0x8] sm:$0xff] %vm104_vm0, %v1763_v34 }
 0x497   :  { %1779 = dma.vmem_to_hbm [thread:$0]  %s1772_s30, 256, %s1774_s9, [#allocation4], %s2086_s21, %s2086_s21, %s2087_s22  }
 0x498   :  { %2078 = dma.done.wait [#allocation4], 256  }
 0x499   :  { %2079 = vsyncadd [#allocation4], 4294967040 }
 0x49a   :  { %2080 = dma.done.wait [#allocation10], 1024  }
 0x49b   :  { %2081 = vsyncadd [#allocation10], 4294966272 }
 0x49c   :  { %1801 = vsyncpa [#allocation3], 1 }
 0x49d   :  { %1802 = vsyncpa [#allocation6], 1 }
 0x49e   :  { %1803 = vsyncpa [#allocation4], 1 }
 0x49f   :  { %1804 = vsyncpa [#allocation10], 1 }

</bundles_post_ra>
